<compile_context>
chip_gen: v7x
topology: tpu7x:2x2x1
jax: 0.10.0
libtpu: 0.0.40
codegen_flags: <defaults>
</compile_context>

<pallas_src>
import functools

import jax
import jax.numpy as jnp
from jax import lax
from jax.experimental import pallas as pl
from jax.experimental.pallas import tpu as pltpu

# ----------------------------- configuration --------------------------------
B = 2            # batch size
N = 8            # nodes per graph
BN = B * N       # flattened node count
NODE_DIM = 5     # raw node feature dim
HIDDEN = 32      # hidden_dim
PROJ = 64        # proj_dim
K = 3            # k nearest neighbours
NUM_MP = 3       # num_message_passes
BOX_LEN = 1.0
OUT_LANES = 128  # packed output width: [z (64) | h (32) | pad (32)]


# ------------------------------ Pallas kernel -------------------------------
def gnn_kernel(x_ref, adj_ref,
               w_e1_ref, b_e1_ref, w_e2_ref, b_e2_ref,
               wm_ref, bm_ref, wu_ref, bu_ref,
               wp1_ref, bp1_ref, wp2_ref, bp2_ref,
               out_ref):
    x = x_ref[...]             # (BN, NODE_DIM)
    adj = adj_ref[...]         # (BN, BN) block-diagonal, pre-normalized (adj/deg)

    # ---- encoder: Linear+ReLU, Linear+ReLU ----
    h = jnp.maximum(
        jnp.dot(x, w_e1_ref[...], preferred_element_type=jnp.float32)
        + b_e1_ref[...], 0.0)
    h = jnp.maximum(
        jnp.dot(h, w_e2_ref[...], preferred_element_type=jnp.float32)
        + b_e2_ref[...], 0.0)

    # ---- message passing rounds (statically unrolled, fused matmuls) ----
    for i in range(NUM_MP):
        wm = wm_ref[i]                      # (H, 2H)  fused [W_sender | W_receiver]
        bm = bm_ref[i]                      # (1, H)
        # one MXU pass produces both sender and receiver projections
        sr = jnp.dot(h, wm, preferred_element_type=jnp.float32)   # (BN, 2H)
        s_proj = sr[:, :HIDDEN]
        r_proj = sr[:, HIDDEN:]
        # msg[dst, src, :] = ReLU(W_s h[src] + W_r h[dst] + b) for every node pair
        msg = jnp.maximum(s_proj[None, :, :] + r_proj[:, None, :] + bm, 0.0)
        # mean-aggregation at dst: 1/deg is pre-folded into adj, no divide here
        agg = jnp.sum(adj[:, :, None] * msg, axis=1)               # (BN, H)

        wu = wu_ref[i]                      # (2H, H)
        bu = bu_ref[i]                      # (1, H)
        # single fused update matmul: concat([h, agg]) @ wu
        upd = jnp.maximum(
            jnp.dot(jnp.concatenate([h, agg], axis=-1), wu,
                    preferred_element_type=jnp.float32) + bu, 0.0)
        h = h + upd                         # skip connection

    # ---- projection head ----
    p = jnp.maximum(
        jnp.dot(h, wp1_ref[...], preferred_element_type=jnp.float32)
        + bp1_ref[...], 0.0)
    z = jnp.dot(p, wp2_ref[...], preferred_element_type=jnp.float32) + bp2_ref[...]

    # lane-dense packed output: [z | h | pad] -> (BN, 128), one full-width store
    pad = jnp.zeros((z.shape[0], OUT_LANES - PROJ - HIDDEN), jnp.float32)
    out_ref[...] = jnp.concatenate([z, h, pad], axis=-1)


# ------------------------------ JAX glue -------------------------------------
def build_graph(positions, k, box_length=BOX_LEN):
    """Periodic k-NN graph -> block-diagonal normalized adjacency (B*N, B*N).

    adj_norm[dst, src] = 1/deg[dst] if (src -> dst) is an edge else 0, so the
    in-kernel aggregation `sum_src adj_norm * msg` reproduces mean aggregation.
    """
    Bb, Nn, _ = positions.shape
    delta = jnp.abs(positions[:, :, None, :] - positions[:, None, :, :])
    delta = jnp.where(delta > 0.5 * box_length, box_length - delta, delta)
    dist = jnp.sqrt(jnp.sum(delta ** 2, axis=-1) + 1e-12)          # (B, N, N)
    # TODO(synk): torch.topk tie-breaking may differ from lax.top_k on exact ties.
    _, idx = lax.top_k(-dist, k + 1)                                # smallest k+1
    nbrs = idx[:, :, 1:]                                            # (B, N, k) dst
    offs = (jnp.arange(Bb) * Nn)[:, None, None]
    src = jnp.broadcast_to(jnp.arange(Nn)[None, :, None], (Bb, Nn, k)) + offs
    dst = nbrs + offs
    adj = jnp.zeros((Bb * Nn, Bb * Nn), jnp.float32).at[
        dst.reshape(-1), src.reshape(-1)].add(1.0)                  # adj[dst, src]
    deg = jnp.maximum(jnp.sum(adj, axis=-1, keepdims=True), 1.0)    # (BN, 1)
    return adj / deg


def init_params(key):
    ks = jax.random.split(key, 16)
    def w(k_, shape, scale=0.2):
        return (scale * jax.random.normal(k_, shape)).astype(jnp.float32)
    params = dict(
        w_e1=w(ks[0], (NODE_DIM, HIDDEN)), b_e1=w(ks[1], (1, HIDDEN)),
        w_e2=w(ks[2], (HIDDEN, HIDDEN)),   b_e2=w(ks[3], (1, HIDDEN)),
        wm=w(ks[4], (NUM_MP, 2 * HIDDEN, HIDDEN)), bm=w(ks[5], (NUM_MP, 1, HIDDEN)),
        wu=w(ks[6], (NUM_MP, 2 * HIDDEN, HIDDEN)), bu=w(ks[7], (NUM_MP, 1, HIDDEN)),
        wp1=w(ks[8], (HIDDEN, HIDDEN)),   bp1=w(ks[9], (1, HIDDEN)),
        wp2=w(ks[10], (HIDDEN, PROJ)),    bp2=w(ks[11], (1, PROJ)),
    )
    return params


@functools.partial(jax.jit, static_argnames=("k",))
def contrastive_gnn_forward(x, positions, params, k=K):
    Bb, Nn, _ = x.shape
    adj_norm = build_graph(positions, k)                            # (BN, BN)

    # Fuse the sender/receiver halves of the message weight:
    # (NUM_MP, 2H, H) -> (NUM_MP, H, 2H) so the kernel needs one dot per round.
    wm_fused = jnp.concatenate(
        [params["wm"][:, :HIDDEN, :], params["wm"][:, HIDDEN:, :]], axis=-1)

    vmem = lambda: pl.BlockSpec(memory_space=pltpu.MemorySpace.VMEM)
    n_in = 14

    packed = pl.pallas_call(
        gnn_kernel,
        out_shape=jax.ShapeDtypeStruct((Bb * Nn, OUT_LANES), jnp.float32),
        in_specs=[vmem() for _ in range(n_in)],
        out_specs=vmem(),
    )(x.reshape(Bb * Nn, -1), adj_norm,
      params["w_e1"], params["b_e1"], params["w_e2"], params["b_e2"],
      wm_fused, params["bm"], params["wu"], params["bu"],
      params["wp1"], params["bp1"], params["wp2"], params["bp2"])

    z = packed[:, :PROJ].reshape(Bb, Nn, PROJ)
    h = packed[:, PROJ:PROJ + HIDDEN].reshape(Bb, Nn, HIDDEN)
    return z, h


# ----------------------- pure-JAX reference (edge-list) ----------------------
def reference_forward(x, positions, params, k=K):
    Bb, Nn, D = x.shape
    relu = jax.nn.relu
    h = x.reshape(-1, D)
    h = relu(h @ params["w_e1"] + params["b_e1"][0])
    h = relu(h @ params["w_e2"] + params["b_e2"][0])

    delta = jnp.abs(positions[:, :, None, :] - positions[:, None, :, :])
    delta = jnp.where(delta > 0.5 * BOX_LEN, BOX_LEN - delta, delta)
    dist = jnp.sqrt(jnp.sum(delta ** 2, axis=-1) + 1e-12)
    _, idx = lax.top_k(-dist, k + 1)
    nbrs = idx[:, :, 1:]
    offs = (jnp.arange(Bb) * Nn)[:, None, None]
    row = (jnp.broadcast_to(jnp.arange(Nn)[None, :, None], (Bb, Nn, k)) + offs).reshape(-1)
    col = (nbrs + offs).reshape(-1)

    for i in range(NUM_MP):
        senders, receivers = h[row], h[col]
        msg = relu(jnp.concatenate([senders, receivers], axis=1)
                   @ params["wm"][i] + params["bm"][i][0])
        agg = jnp.zeros_like(h).at[col].add(msg)
        deg = jnp.zeros((h.shape[0],)).at[col].add(1.0)
        deg = jnp.maximum(deg, 1.0)
        agg = agg / deg[:, None]
        h = h + relu(jnp.concatenate([h, agg], axis=1)
                     @ params["wu"][i] + params["bu"][i][0])

    p = relu(h @ params["wp1"] + params["bp1"][0])
    z = p @ params["wp2"] + params["bp2"][0]
    return z.reshape(Bb, Nn, -1), h.reshape(Bb, Nn, -1)


# ---------------------------------- main -------------------------------------
if __name__ == "__main__":
    key = jax.random.PRNGKey(0)
    kx, kp, kw = jax.random.split(key, 3)
    x = jax.random.normal(kx, (B, N, NODE_DIM), dtype=jnp.float32)
    positions = jax.random.uniform(kp, (B, N, 3), dtype=jnp.float32)  # unit box
    params = init_params(kw)

    z, h = contrastive_gnn_forward(x, positions, params)
    jax.block_until_ready((z, h))

    z_ref, h_ref = reference_forward(x, positions, params)
    assert z.shape == (B, N, PROJ) and h.shape == (B, N, HIDDEN)
    assert jnp.allclose(z, z_ref, atol=1e-4, rtol=1e-4)
    assert jnp.allclose(h, h_ref, atol=1e-4, rtol=1e-4)

    print("KERNEL_OK")
</pallas_src>

<mosaic_0001>
module attributes {stable_mosaic.version = 11 : i64} {
  func.func private @main(%arg0: i32) attributes {dimension_semantics = [#tpu.dimension_semantics<core_parallel>], iteration_bounds = array<i64: 2>, tpu.core_type = #tpu.core_type<sc_scalar_subcore>, window_params = []} {
    return
  }
}

module attributes {stable_mosaic.version = 11 : i64} {
  func.func private @main(%arg0: i32) attributes {dimension_semantics = [#tpu.dimension_semantics<core_parallel>], iteration_bounds = array<i64: 2>, tpu.core_type = #tpu.core_type<sc_scalar_subcore>, window_params = []} {
    return
  }
}

module attributes {stable_mosaic.version = 11 : i64} {
  func.func @gnn_kernel(%arg0: memref<16x5xf32, #tpu.memory_space<vmem>>, %arg1: memref<16x16xf32, #tpu.memory_space<vmem>>, %arg2: memref<5x32xf32, #tpu.memory_space<vmem>>, %arg3: memref<1x32xf32, #tpu.memory_space<vmem>>, %arg4: memref<32x32xf32, #tpu.memory_space<vmem>>, %arg5: memref<1x32xf32, #tpu.memory_space<vmem>>, %arg6: memref<3x32x64xf32, #tpu.memory_space<vmem>>, %arg7: memref<3x1x32xf32, #tpu.memory_space<vmem>>, %arg8: memref<3x64x32xf32, #tpu.memory_space<vmem>>, %arg9: memref<3x1x32xf32, #tpu.memory_space<vmem>>, %arg10: memref<32x32xf32, #tpu.memory_space<vmem>>, %arg11: memref<1x32xf32, #tpu.memory_space<vmem>>, %arg12: memref<32x64xf32, #tpu.memory_space<vmem>>, %arg13: memref<1x64xf32, #tpu.memory_space<vmem>>, %arg14: memref<16x128xf32, #tpu.memory_space<vmem>>) attributes {dimension_semantics = [], scalar_prefetch = 0 : i64, scratch_operands = 0 : i64, tpu.core_type = #tpu.core_type<tc>} {
    %c0 = arith.constant 0 : index
    %c0_0 = arith.constant 0 : index
    %0 = vector.load %arg0[%c0, %c0_0] : memref<16x5xf32, #tpu.memory_space<vmem>>, vector<16x5xf32>
    %c0_1 = arith.constant 0 : index
    %c0_2 = arith.constant 0 : index
    %1 = vector.load %arg1[%c0_1, %c0_2] : memref<16x16xf32, #tpu.memory_space<vmem>>, vector<16x16xf32>
    %c0_3 = arith.constant 0 : index
    %c0_4 = arith.constant 0 : index
    %2 = vector.load %arg2[%c0_3, %c0_4] : memref<5x32xf32, #tpu.memory_space<vmem>>, vector<5x32xf32>
    %cst = arith.constant dense<0.000000e+00> : vector<16x32xf32>
    %3 = tpu.matmul %0, %2, %cst {dimension_numbers = #tpu.dot_dimension_numbers<[1], [0], [0], [1], [0, 0, 1, 1], [], []>} : vector<16x5xf32>, vector<5x32xf32>, vector<16x32xf32> -> vector<16x32xf32>
    %c0_5 = arith.constant 0 : index
    %c0_6 = arith.constant 0 : index
    %4 = vector.load %arg3[%c0_5, %c0_6] : memref<1x32xf32, #tpu.memory_space<vmem>>, vector<1x32xf32>
    %5 = vector.broadcast %4 : vector<1x32xf32> to vector<16x32xf32>
    %6 = arith.addf %3, %5 : vector<16x32xf32>
    %cst_7 = arith.constant 0.000000e+00 : f32
    %7 = vector.broadcast %cst_7 : f32 to vector<16x32xf32>
    %8 = arith.maximumf %6, %7 : vector<16x32xf32>
    %c0_8 = arith.constant 0 : index
    %c0_9 = arith.constant 0 : index
    %9 = vector.load %arg4[%c0_8, %c0_9] : memref<32x32xf32, #tpu.memory_space<vmem>>, vector<32x32xf32>
    %cst_10 = arith.constant dense<0.000000e+00> : vector<16x32xf32>
    %10 = tpu.matmul %8, %9, %cst_10 {dimension_numbers = #tpu.dot_dimension_numbers<[1], [0], [0], [1], [0, 0, 1, 1], [], []>} : vector<16x32xf32>, vector<32x32xf32>, vector<16x32xf32> -> vector<16x32xf32>
    %c0_11 = arith.constant 0 : index
    %c0_12 = arith.constant 0 : index
    %11 = vector.load %arg5[%c0_11, %c0_12] : memref<1x32xf32, #tpu.memory_space<vmem>>, vector<1x32xf32>
    %12 = vector.broadcast %11 : vector<1x32xf32> to vector<16x32xf32>
    %13 = arith.addf %10, %12 : vector<16x32xf32>
    %cst_13 = arith.constant 0.000000e+00 : f32
    %14 = vector.broadcast %cst_13 : f32 to vector<16x32xf32>
    %15 = arith.maximumf %13, %14 : vector<16x32xf32>
    %c0_14 = arith.constant 0 : index
    %c0_15 = arith.constant 0 : index
    %c0_16 = arith.constant 0 : index
    %16 = vector.load %arg6[%c0_14, %c0_15, %c0_16] : memref<3x32x64xf32, #tpu.memory_space<vmem>>, vector<1x32x64xf32>
    %17 = vector.shape_cast %16 : vector<1x32x64xf32> to vector<32x64xf32>
    %c0_17 = arith.constant 0 : index
    %c0_18 = arith.constant 0 : index
    %c0_19 = arith.constant 0 : index
    %18 = vector.load %arg7[%c0_17, %c0_18, %c0_19] : memref<3x1x32xf32, #tpu.memory_space<vmem>>, vector<1x1x32xf32>
    %19 = vector.shape_cast %18 : vector<1x1x32xf32> to vector<1x32xf32>
    %cst_20 = arith.constant dense<0.000000e+00> : vector<16x64xf32>
    %20 = tpu.matmul %15, %17, %cst_20 {dimension_numbers = #tpu.dot_dimension_numbers<[1], [0], [0], [1], [0, 0, 1, 1], [], []>} : vector<16x32xf32>, vector<32x64xf32>, vector<16x64xf32> -> vector<16x64xf32>
    %21 = vector.extract_strided_slice %20 {offsets = [0, 0], sizes = [16, 32], strides = [1, 1]} : vector<16x64xf32> to vector<16x32xf32>
    %22 = vector.extract_strided_slice %20 {offsets = [0, 32], sizes = [16, 32], strides = [1, 1]} : vector<16x64xf32> to vector<16x32xf32>
    %23 = vector.shape_cast %21 : vector<16x32xf32> to vector<1x16x32xf32>
    %24 = vector.shape_cast %22 : vector<16x32xf32> to vector<16x1x32xf32>
    %25 = vector.broadcast %23 : vector<1x16x32xf32> to vector<16x16x32xf32>
    %26 = vector.broadcast %24 : vector<16x1x32xf32> to vector<16x16x32xf32>
    %27 = arith.addf %25, %26 : vector<16x16x32xf32>
    %28 = vector.shape_cast %19 : vector<1x32xf32> to vector<1x1x32xf32>
    %29 = vector.broadcast %28 : vector<1x1x32xf32> to vector<16x16x32xf32>
    %30 = arith.addf %27, %29 : vector<16x16x32xf32>
    %cst_21 = arith.constant 0.000000e+00 : f32
    %31 = vector.broadcast %cst_21 : f32 to vector<16x16x32xf32>
    %32 = arith.maximumf %30, %31 : vector<16x16x32xf32>
    %33 = vector.shape_cast %1 : vector<16x16xf32> to vector<16x16x1xf32>
    %34 = vector.broadcast %33 : vector<16x16x1xf32> to vector<16x16x32xf32>
    %35 = arith.mulf %34, %32 : vector<16x16x32xf32>
    %cst_22 = arith.constant dense<0.000000e+00> : vector<16x32xf32>
    %36 = vector.multi_reduction <add>, %35, %cst_22 [1] : vector<16x16x32xf32> to vector<16x32xf32>
    %c0_23 = arith.constant 0 : index
    %c0_24 = arith.constant 0 : index
    %c0_25 = arith.constant 0 : index
    %37 = vector.load %arg8[%c0_23, %c0_24, %c0_25] : memref<3x64x32xf32, #tpu.memory_space<vmem>>, vector<1x64x32xf32>
    %38 = vector.shape_cast %37 : vector<1x64x32xf32> to vector<64x32xf32>
    %c0_26 = arith.constant 0 : index
    %c0_27 = arith.constant 0 : index
    %c0_28 = arith.constant 0 : index
    %39 = vector.load %arg9[%c0_26, %c0_27, %c0_28] : memref<3x1x32xf32, #tpu.memory_space<vmem>>, vector<1x1x32xf32>
    %40 = vector.shape_cast %39 : vector<1x1x32xf32> to vector<1x32xf32>
    %41 = tpu.concatenate %15, %36 in 1 : vector<16x32xf32>, vector<16x32xf32> -> vector<16x64xf32>
    %cst_29 = arith.constant dense<0.000000e+00> : vector<16x32xf32>
    %42 = tpu.matmul %41, %38, %cst_29 {dimension_numbers = #tpu.dot_dimension_numbers<[1], [0], [0], [1], [0, 0, 1, 1], [], []>} : vector<16x64xf32>, vector<64x32xf32>, vector<16x32xf32> -> vector<16x32xf32>
    %43 = vector.broadcast %40 : vector<1x32xf32> to vector<16x32xf32>
    %44 = arith.addf %42, %43 : vector<16x32xf32>
    %cst_30 = arith.constant 0.000000e+00 : f32
    %45 = vector.broadcast %cst_30 : f32 to vector<16x32xf32>
    %46 = arith.maximumf %44, %45 : vector<16x32xf32>
    %47 = arith.addf %15, %46 : vector<16x32xf32>
    %c1 = arith.constant 1 : index
    %c0_31 = arith.constant 0 : index
    %c0_32 = arith.constant 0 : index
    %48 = vector.load %arg6[%c1, %c0_31, %c0_32] : memref<3x32x64xf32, #tpu.memory_space<vmem>>, vector<1x32x64xf32>
    %49 = vector.shape_cast %48 : vector<1x32x64xf32> to vector<32x64xf32>
    %c1_33 = arith.constant 1 : index
    %c0_34 = arith.constant 0 : index
    %c0_35 = arith.constant 0 : index
    %50 = vector.load %arg7[%c1_33, %c0_34, %c0_35] : memref<3x1x32xf32, #tpu.memory_space<vmem>>, vector<1x1x32xf32>
    %51 = vector.shape_cast %50 : vector<1x1x32xf32> to vector<1x32xf32>
    %cst_36 = arith.constant dense<0.000000e+00> : vector<16x64xf32>
    %52 = tpu.matmul %47, %49, %cst_36 {dimension_numbers = #tpu.dot_dimension_numbers<[1], [0], [0], [1], [0, 0, 1, 1], [], []>} : vector<16x32xf32>, vector<32x64xf32>, vector<16x64xf32> -> vector<16x64xf32>
    %53 = vector.extract_strided_slice %52 {offsets = [0, 0], sizes = [16, 32], strides = [1, 1]} : vector<16x64xf32> to vector<16x32xf32>
    %54 = vector.extract_strided_slice %52 {offsets = [0, 32], sizes = [16, 32], strides = [1, 1]} : vector<16x64xf32> to vector<16x32xf32>
    %55 = vector.shape_cast %53 : vector<16x32xf32> to vector<1x16x32xf32>
    %56 = vector.shape_cast %54 : vector<16x32xf32> to vector<16x1x32xf32>
    %57 = vector.broadcast %55 : vector<1x16x32xf32> to vector<16x16x32xf32>
    %58 = vector.broadcast %56 : vector<16x1x32xf32> to vector<16x16x32xf32>
    %59 = arith.addf %57, %58 : vector<16x16x32xf32>
    %60 = vector.shape_cast %51 : vector<1x32xf32> to vector<1x1x32xf32>
    %61 = vector.broadcast %60 : vector<1x1x32xf32> to vector<16x16x32xf32>
    %62 = arith.addf %59, %61 : vector<16x16x32xf32>
    %cst_37 = arith.constant 0.000000e+00 : f32
    %63 = vector.broadcast %cst_37 : f32 to vector<16x16x32xf32>
    %64 = arith.maximumf %62, %63 : vector<16x16x32xf32>
    %65 = vector.shape_cast %1 : vector<16x16xf32> to vector<16x16x1xf32>
    %66 = vector.broadcast %65 : vector<16x16x1xf32> to vector<16x16x32xf32>
    %67 = arith.mulf %66, %64 : vector<16x16x32xf32>
    %cst_38 = arith.constant dense<0.000000e+00> : vector<16x32xf32>
    %68 = vector.multi_reduction <add>, %67, %cst_38 [1] : vector<16x16x32xf32> to vector<16x32xf32>
    %c1_39 = arith.constant 1 : index
    %c0_40 = arith.constant 0 : index
    %c0_41 = arith.constant 0 : index
    %69 = vector.load %arg8[%c1_39, %c0_40, %c0_41] : memref<3x64x32xf32, #tpu.memory_space<vmem>>, vector<1x64x32xf32>
    %70 = vector.shape_cast %69 : vector<1x64x32xf32> to vector<64x32xf32>
    %c1_42 = arith.constant 1 : index
    %c0_43 = arith.constant 0 : index
    %c0_44 = arith.constant 0 : index
    %71 = vector.load %arg9[%c1_42, %c0_43, %c0_44] : memref<3x1x32xf32, #tpu.memory_space<vmem>>, vector<1x1x32xf32>
    %72 = vector.shape_cast %71 : vector<1x1x32xf32> to vector<1x32xf32>
    %73 = tpu.concatenate %47, %68 in 1 : vector<16x32xf32>, vector<16x32xf32> -> vector<16x64xf32>
    %cst_45 = arith.constant dense<0.000000e+00> : vector<16x32xf32>
    %74 = tpu.matmul %73, %70, %cst_45 {dimension_numbers = #tpu.dot_dimension_numbers<[1], [0], [0], [1], [0, 0, 1, 1], [], []>} : vector<16x64xf32>, vector<64x32xf32>, vector<16x32xf32> -> vector<16x32xf32>
    %75 = vector.broadcast %72 : vector<1x32xf32> to vector<16x32xf32>
    %76 = arith.addf %74, %75 : vector<16x32xf32>
    %cst_46 = arith.constant 0.000000e+00 : f32
    %77 = vector.broadcast %cst_46 : f32 to vector<16x32xf32>
    %78 = arith.maximumf %76, %77 : vector<16x32xf32>
    %79 = arith.addf %47, %78 : vector<16x32xf32>
    %c2 = arith.constant 2 : index
    %c0_47 = arith.constant 0 : index
    %c0_48 = arith.constant 0 : index
    %80 = vector.load %arg6[%c2, %c0_47, %c0_48] : memref<3x32x64xf32, #tpu.memory_space<vmem>>, vector<1x32x64xf32>
    %81 = vector.shape_cast %80 : vector<1x32x64xf32> to vector<32x64xf32>
    %c2_49 = arith.constant 2 : index
    %c0_50 = arith.constant 0 : index
    %c0_51 = arith.constant 0 : index
    %82 = vector.load %arg7[%c2_49, %c0_50, %c0_51] : memref<3x1x32xf32, #tpu.memory_space<vmem>>, vector<1x1x32xf32>
    %83 = vector.shape_cast %82 : vector<1x1x32xf32> to vector<1x32xf32>
    %cst_52 = arith.constant dense<0.000000e+00> : vector<16x64xf32>
    %84 = tpu.matmul %79, %81, %cst_52 {dimension_numbers = #tpu.dot_dimension_numbers<[1], [0], [0], [1], [0, 0, 1, 1], [], []>} : vector<16x32xf32>, vector<32x64xf32>, vector<16x64xf32> -> vector<16x64xf32>
    %85 = vector.extract_strided_slice %84 {offsets = [0, 0], sizes = [16, 32], strides = [1, 1]} : vector<16x64xf32> to vector<16x32xf32>
    %86 = vector.extract_strided_slice %84 {offsets = [0, 32], sizes = [16, 32], strides = [1, 1]} : vector<16x64xf32> to vector<16x32xf32>
    %87 = vector.shape_cast %85 : vector<16x32xf32> to vector<1x16x32xf32>
    %88 = vector.shape_cast %86 : vector<16x32xf32> to vector<16x1x32xf32>
    %89 = vector.broadcast %87 : vector<1x16x32xf32> to vector<16x16x32xf32>
    %90 = vector.broadcast %88 : vector<16x1x32xf32> to vector<16x16x32xf32>
    %91 = arith.addf %89, %90 : vector<16x16x32xf32>
    %92 = vector.shape_cast %83 : vector<1x32xf32> to vector<1x1x32xf32>
    %93 = vector.broadcast %92 : vector<1x1x32xf32> to vector<16x16x32xf32>
    %94 = arith.addf %91, %93 : vector<16x16x32xf32>
    %cst_53 = arith.constant 0.000000e+00 : f32
    %95 = vector.broadcast %cst_53 : f32 to vector<16x16x32xf32>
    %96 = arith.maximumf %94, %95 : vector<16x16x32xf32>
    %97 = vector.shape_cast %1 : vector<16x16xf32> to vector<16x16x1xf32>
    %98 = vector.broadcast %97 : vector<16x16x1xf32> to vector<16x16x32xf32>
    %99 = arith.mulf %98, %96 : vector<16x16x32xf32>
    %cst_54 = arith.constant dense<0.000000e+00> : vector<16x32xf32>
    %100 = vector.multi_reduction <add>, %99, %cst_54 [1] : vector<16x16x32xf32> to vector<16x32xf32>
    %c2_55 = arith.constant 2 : index
    %c0_56 = arith.constant 0 : index
    %c0_57 = arith.constant 0 : index
    %101 = vector.load %arg8[%c2_55, %c0_56, %c0_57] : memref<3x64x32xf32, #tpu.memory_space<vmem>>, vector<1x64x32xf32>
    %102 = vector.shape_cast %101 : vector<1x64x32xf32> to vector<64x32xf32>
    %c2_58 = arith.constant 2 : index
    %c0_59 = arith.constant 0 : index
    %c0_60 = arith.constant 0 : index
    %103 = vector.load %arg9[%c2_58, %c0_59, %c0_60] : memref<3x1x32xf32, #tpu.memory_space<vmem>>, vector<1x1x32xf32>
    %104 = vector.shape_cast %103 : vector<1x1x32xf32> to vector<1x32xf32>
    %105 = tpu.concatenate %79, %100 in 1 : vector<16x32xf32>, vector<16x32xf32> -> vector<16x64xf32>
    %cst_61 = arith.constant dense<0.000000e+00> : vector<16x32xf32>
    %106 = tpu.matmul %105, %102, %cst_61 {dimension_numbers = #tpu.dot_dimension_numbers<[1], [0], [0], [1], [0, 0, 1, 1], [], []>} : vector<16x64xf32>, vector<64x32xf32>, vector<16x32xf32> -> vector<16x32xf32>
    %107 = vector.broadcast %104 : vector<1x32xf32> to vector<16x32xf32>
    %108 = arith.addf %106, %107 : vector<16x32xf32>
    %cst_62 = arith.constant 0.000000e+00 : f32
    %109 = vector.broadcast %cst_62 : f32 to vector<16x32xf32>
    %110 = arith.maximumf %108, %109 : vector<16x32xf32>
    %111 = arith.addf %79, %110 : vector<16x32xf32>
    %c0_63 = arith.constant 0 : index
    %c0_64 = arith.constant 0 : index
    %112 = vector.load %arg10[%c0_63, %c0_64] : memref<32x32xf32, #tpu.memory_space<vmem>>, vector<32x32xf32>
    %cst_65 = arith.constant dense<0.000000e+00> : vector<16x32xf32>
    %113 = tpu.matmul %111, %112, %cst_65 {dimension_numbers = #tpu.dot_dimension_numbers<[1], [0], [0], [1], [0, 0, 1, 1], [], []>} : vector<16x32xf32>, vector<32x32xf32>, vector<16x32xf32> -> vector<16x32xf32>
    %c0_66 = arith.constant 0 : index
    %c0_67 = arith.constant 0 : index
    %114 = vector.load %arg11[%c0_66, %c0_67] : memref<1x32xf32, #tpu.memory_space<vmem>>, vector<1x32xf32>
    %115 = vector.broadcast %114 : vector<1x32xf32> to vector<16x32xf32>
    %116 = arith.addf %113, %115 : vector<16x32xf32>
    %cst_68 = arith.constant 0.000000e+00 : f32
    %117 = vector.broadcast %cst_68 : f32 to vector<16x32xf32>
    %118 = arith.maximumf %116, %117 : vector<16x32xf32>
    %c0_69 = arith.constant 0 : index
    %c0_70 = arith.constant 0 : index
    %119 = vector.load %arg12[%c0_69, %c0_70] : memref<32x64xf32, #tpu.memory_space<vmem>>, vector<32x64xf32>
    %cst_71 = arith.constant dense<0.000000e+00> : vector<16x64xf32>
    %120 = tpu.matmul %118, %119, %cst_71 {dimension_numbers = #tpu.dot_dimension_numbers<[1], [0], [0], [1], [0, 0, 1, 1], [], []>} : vector<16x32xf32>, vector<32x64xf32>, vector<16x64xf32> -> vector<16x64xf32>
    %c0_72 = arith.constant 0 : index
    %c0_73 = arith.constant 0 : index
    %121 = vector.load %arg13[%c0_72, %c0_73] : memref<1x64xf32, #tpu.memory_space<vmem>>, vector<1x64xf32>
    %122 = vector.broadcast %121 : vector<1x64xf32> to vector<16x64xf32>
    %123 = arith.addf %120, %122 : vector<16x64xf32>
    %cst_74 = arith.constant 0.000000e+00 : f32
    %124 = vector.broadcast %cst_74 : f32 to vector<16x32xf32>
    %125 = tpu.concatenate %123, %111, %124 in 1 : vector<16x64xf32>, vector<16x32xf32>, vector<16x32xf32> -> vector<16x128xf32>
    %c0_75 = arith.constant 0 : index
    %c0_76 = arith.constant 0 : index
    %126 = vector.load %arg14[%c0_75, %c0_76] : memref<16x128xf32, #tpu.memory_space<vmem>>, vector<16x128xf32>
    tpu.vector_store %arg14[%c0_75, %c0_76], %125 {strides = array<i32>} : memref<16x128xf32, #tpu.memory_space<vmem>>, vector<16x128xf32>,
    return
  }
}

</mosaic_0001>

<bundles_post_ra>
// kernel: contrastive_gnn_forward.1
= control target key start
LH: loop header
LB: loop body
LE: loop exit
PB: predicated region body
PF: predicated region fallthrough
CT: control target
= control target key end

     0   :  { %vm66_vm0 = vcmask 1044480   ;;  %vm59_vm1 = vcmask 39936   ;;  %vm158_vm2 = vcmask 261120   ;;  %v334_v22 = vlaneseq  ;;  %s3137_s20 = smov 32   ;;  %s4268_s2 = inlined_call_operand.vmem [shape: f32[5,32], index: 2, kind: input, shape index: {}]   ;;  %s4269_s0 = inlined_call_operand.vmem [shape: f32[16,5], index: 0, kind: input, shape index: {}]   ;;  %s4270_s4 = inlined_call_operand.vmem [shape: f32[32,32], index: 4, kind: input, shape index: {}]   ;;  %s4271_s6 = inlined_call_operand.vmem [shape: f32[3,32,64], index: 6, kind: input, shape index: {}]   ;;  %s4272_s3 = inlined_call_operand.vmem [shape: f32[1,32], index: 3, kind: input, shape index: {}]   ;;  %s4273_s1 = inlined_call_operand.vmem [shape: f32[16,16], index: 1, kind: input, shape index: {}]   ;;  %s4274_s5 = inlined_call_operand.vmem [shape: f32[1,32], index: 5, kind: input, shape index: {}]   ;;  %s4275_s8 = inlined_call_operand.vmem [shape: f32[3,64,32], index: 8, kind: input, shape index: {}]   ;;  %s4276_s7 = inlined_call_operand.vmem [shape: f32[3,1,32], index: 7, kind: input, shape index: {}]   ;;  %s4277_s9 = inlined_call_operand.vmem [shape: f32[3,1,32], index: 9, kind: input, shape index: {}]   ;;  %s4278_s10 = inlined_call_operand.vmem [shape: f32[32,32], index: 10, kind: input, shape index: {}]   ;;  %s4279_s12 = inlined_call_operand.vmem [shape: f32[32,64], index: 12, kind: input, shape index: {}]   ;;  %s4280_s11 = inlined_call_operand.vmem [shape: f32[1,32], index: 11, kind: input, shape index: {}]   ;;  %s4281_s13 = inlined_call_operand.vmem [shape: f32[1,64], index: 13, kind: input, shape index: {}]   ;;  %s4282_s14 = inlined_call_operand.vmem [shape: f32[16,128], index: 14, kind: output, shape index: {}]  }
   0x1   :  { %v51_v0 = vld [vmem:[%s4268_s2] sm:$0x1f]  ;;  %v48_v2 = vld [vmem:[%s4269_s0 + $0x8] sm:$0xff]  ;;  %v149_v6 = vld [vmem:[%s4270_s4 + $0x10] sm:$0xff]  ;;  %v3135_v55 = vmov 1966171168  }
   0x2   :  { %v47_v1 = vld [vmem:[%s4269_s0] sm:$0xff]  ;;  %2907 = vmatprep.subr.msk.mxu0 %vm66_vm0, %v51_v0  ;;  %v148_v4 = vld [vmem:[%s4270_s4 + $0x8] sm:$0xff]  ;;  %v150_v7 = vld [vmem:[%s4270_s4 + $0x18] sm:$0xff]  ;;  %v3252_v23 = vshrl.u32 %v334_v22, 7  ;;  %v332_v56 = vunpack.c.l.s4 %v3135_v55  ;;  %vm1019_vm3 = vcmask 1041409   ;;  %vm1023_vm4 = vcmask 1043459  }
   0x3   :  { %2909 = vmatprep.mubr.msk.f32.mxu0 %vm59_vm1, %v47_v1  ;;  %v147_v3 = vld [vmem:[%s4270_s4] sm:$0xff]  ;;  %2908 = vmatpush3.msk.msra.mxu0 %vm66_vm0, %v51_v0  ;;  %v3039_v8 = vpack.c.bf16 %v150_v7, %v149_v6  ;;  %v243_v10 = vld [vmem:[%s4271_s6 + $0x8] sm:$0xff]  ;;  %v244_v19 = vld [vmem:[%s4271_s6 + $0x10] sm:$0xff]  ;;  %vm1021_vm5 = vcmask 1042434   ;;  %vm1025_vm6 = vcmask 1044484   ;;  %vm1027_vm7 = vcmask 1045509  }
   0x4   :  { %v3035_v5 = vpack.c.bf16 %v148_v4, %v147_v3  ;;  %2910 = vmatmul.mubr.msk.f32.vlgmr.msra.gmra.mrb[0].mxu0 %vm59_vm1, %v48_v2  ;;  %v242_v9 = vld [vmem:[%s4271_s6] sm:$0xff]  ;;  %v245_v20 = vld [vmem:[%s4271_s6 + $0x18] sm:$0xff]  ;;  %v3258_v25 = vsub.s32 0, %v3252_v23  ;;  %v655_v26 = vsub.s32 1, %v3252_v23  ;;  %v666_v29 = vsub.s32 2, %v3252_v23  ;;  %v3266_v31 = vld [vmem:[%s4273_s1 + $0x8] sm:$0xff] }
   0x5   :  { %v3043_v11 = vpack.c.bf16 %v243_v10, %v242_v9  ;;  %v2779_v12 = vld [vmem:[%s4272_s3] ss:$0 sm:$0xff]  ;;  %v3047_v21 = vpack.c.bf16 %v245_v20, %v244_v19  ;;  %v677_v34 = vsub.s32 3, %v3252_v23  ;;  %v688_v37 = vsub.s32 4, %v3252_v23 }
   0x6   :  { %3036 = vmatprep.subr.bf16.mxu1 %v3035_v5  ;;  %v49_v24 = vld [vmem:[%s4273_s1] sm:$0xff]  ;;  %v733_v32 = vrot.slane %v3266_v31, %v3258_v25  ;;  %v744_v33 = vrot.slane %v3266_v31, %v655_v26  ;;  %v755_v36 = vrot.slane %v3266_v31, %v666_v29  ;;  %v699_v40 = vsub.s32 5, %v3252_v23 }
   0x7   :  { %3038 = vmatpush3.bf16.msra.mxu1 %v3035_v5  ;;  %3044 = vmatprep.subr.bf16.mxu0 %v3043_v11  ;;  %v645_v27 = vrot.slane %v49_v24, %v3258_v25  ;;  %v656_v28 = vrot.slane %v49_v24, %v655_v26  ;;  %v667_v30 = vrot.slane %v49_v24, %v666_v29  ;;  %v710_v43 = vsub.s32 6, %v3252_v23  ;;  %v2783_v46 = vld [vmem:[%s4274_s5] ss:$0 sm:$0xff]  ;;  %s3136_s5 = smov 96  }
   0x8   :  { %3040 = vmatprep.subr.bf16.mxu1 %v3039_v8  ;;  %3046 = vmatpush3.bf16.msra.mxu0 %v3043_v11  ;;  %v678_v35 = vrot.slane %v49_v24, %v677_v34  ;;  %v689_v38 = vrot.slane %v49_v24, %v688_v37  ;;  %v766_v39 = vrot.slane %v3266_v31, %v677_v34  ;;  %v721_v53 = vsub.s32 7, %v3252_v23 }
   0x9   :  { %3048 = vmatprep.subr.bf16.mxu0 %v3047_v21  ;;  %647 = vbcast.lane.b32.xlu1 %v645_v27, 256  ;;  %v700_v41 = vrot.slane %v49_v24, %v699_v40  ;;  %v777_v42 = vrot.slane %v3266_v31, %v688_v37  ;;  %v711_v44 = vrot.slane %v49_v24, %v710_v43  ;;  %v333_v57 = vunpack.c.0.s8 %v332_v56  ;;  %v994_v56 = vld [vmem:[%s4275_s8] sm:$0xff] }
   0xa   :  { %651 = vbcast.lane.b32.xlu0 %v645_v27, 264  ;;  %v788_v45 = vrot.slane %v3266_v31, %v699_v40  ;;  %v722_v54 = vrot.slane %v49_v24, %v721_v53  ;;  %vm1029_vm8 = vcmask 1046534   ;;  %vm1031_vm9 = vcmask 1047559  }
   0xb   :  { %3042 = vmatpush3.bf16.msra.mxu1 %v3039_v8  ;;  %v3296_v58 = vsub.s32 %v333_v57, %v3252_v23  ;;  %v995_v57 = vld [vmem:[%s4275_s8 + $0x8] sm:$0xff]  ;;  %vm1054_vm10 = vcmask 523264   ;;  %vm2770_vm11 = vcmask 785408  }
   0xc   :  { %3050 = vmatpush3.bf16.msra.mxu0 %v3047_v21 }
   0xd   :  { %658 = vbcast.lane.b32.xlu1 %v656_v28, 256 }
   0xe   :  { %662 = vbcast.lane.b32.xlu0 %v656_v28, 264 }
  0x11   :  { %673 = vbcast.lane.b32.xlu1 %v667_v30, 264 }
  0x12   :  { %669 = vbcast.lane.b32.xlu0 %v667_v30, 256 }
  0x15   :  { %739 = vbcast.lane.b32.xlu1 %v733_v32, 264 }
  0x16   :  { %735 = vbcast.lane.b32.xlu0 %v733_v32, 256 }
  0x19   :  { %750 = vbcast.lane.b32.xlu1 %v744_v33, 264 }
  0x1a   :  { %746 = vbcast.lane.b32.xlu0 %v744_v33, 256 }
  0x1d   :  { %684 = vbcast.lane.b32.xlu1 %v678_v35, 264 }
  0x1e   :  { %680 = vbcast.lane.b32.xlu0 %v678_v35, 256 }
  0x21   :  { %761 = vbcast.lane.b32.xlu1 %v755_v36, 264 }
  0x22   :  { %757 = vbcast.lane.b32.xlu0 %v755_v36, 256 }
  0x25   :  { %695 = vbcast.lane.b32.xlu1 %v689_v38, 264 }
  0x26   :  { %691 = vbcast.lane.b32.xlu0 %v689_v38, 256 }
  0x29   :  { %772 = vbcast.lane.b32.xlu1 %v766_v39, 264 }
  0x2a   :  { %768 = vbcast.lane.b32.xlu0 %v766_v39, 256 }
  0x2d   :  { %706 = vbcast.lane.b32.xlu1 %v700_v41, 264 }
  0x2e   :  { %702 = vbcast.lane.b32.xlu0 %v700_v41, 256 }
  0x31   :  { %783 = vbcast.lane.b32.xlu1 %v777_v42, 264 }
  0x32   :  { %779 = vbcast.lane.b32.xlu0 %v777_v42, 256  ;;  %v799_v42 = vrot.slane %v3266_v31, %v710_v43 }
  0x35   :  { %717 = vbcast.lane.b32.xlu1 %v711_v44, 264 }
  0x36   :  { %713 = vbcast.lane.b32.xlu0 %v711_v44, 256 }
  0x39   :  { %794 = vbcast.lane.b32.xlu1 %v788_v45, 264 }
  0x3a   :  { %790 = vbcast.lane.b32.xlu0 %v788_v45, 256 }
  0x3d   :  { %728 = vbcast.lane.b32.xlu1 %v722_v54, 264 }
  0x3e   :  { %724 = vbcast.lane.b32.xlu0 %v722_v54, 256 }
  0x7b   :  { %v3355_v44 = vpop.permute.xlu1 %647 }
  0x7c   :  { %v3357_v45 = vpop.permute.xlu0 %651 }
  0xd7   :  { %v2911_v13 = vpop.f32.mrb[0].mxu0 }
  0xd8   :  { %v142_v14 = vadd.f32 %v2911_v13, %v2779_v12  ;;  %v136_v15 = vpop.f32.mrb[1].mxu0 }
  0xd9   :  { %v137_v16 = vadd.f32 %v2779_v12, %v136_v15 }
  0xda   :  { %v146_v18 = vmax.f32 %v142_v14, 0.0 }
  0xdb   :  { %v145_v17 = vmax.f32 %v137_v16, 0.0 }
  0xdd   :  { %2920 = vmatprep.mubr.msk.f32.mxu1 %vm158_vm2, %v145_v17 }
  0xde   :  { %2921 = vmatmul.mubr.msk.f32.vlgmr.msra.gmra.mrb[0].mxu1 %vm158_vm2, %v146_v18 }
 0x1b1   :  { %v2922_v47 = vpop.f32.mrb[0].mxu1 }
 0x1b2   :  { %v237_v48 = vadd.f32 %v2922_v47, %v2783_v46  ;;  %v231_v49 = vpop.f32.mrb[1].mxu1  ;;  %v3362_v47 = vpop.permute.xlu1 %658 }
 0x1b3   :  { %v232_v50 = vadd.f32 %v2783_v46, %v231_v49  ;;  %v810_v46 = vrot.slane %v3266_v31, %v721_v53 }
 0x1b4   :  { %v3286_v52 = vmax.f32 %v237_v48, 0.0  ;;  %v3364_v48 = vpop.permute.xlu0 %662 }
 0x1b5   :  { %v3284_v51 = vmax.f32 %v232_v50, 0.0 }
 0x1b6   :  { %v3366_v49 = vpop.permute.xlu1 %673 }
 0x1b7   :  { %2931 = vmatprep.mubr.msk.f32.mxu0 %vm158_vm2, %v3284_v51  ;;  %4302 = vst [vmem:[#allocation2_spill] sm:$0xff] %v3366_v49 }
 0x1b8   :  { %2932 = vmatmul.mubr.msk.f32.vlgmr.msra.gmra.mrb[2].mxu0 %vm158_vm2, %v3286_v52  ;;  %v3368_v43 = vpop.permute.xlu0 %669 }
 0x1b9   :  { %4303 = vst [vmem:[#allocation3_spill] sm:$0xff] %v3368_v43 }
 0x1ba   :  { %v3370_v50 = vpop.permute.xlu1 %739 }
 0x1bc   :  { %v3372_v54 = vpop.permute.xlu0 %735 }
 0x1be   :  { %v3374_v55 = vpop.permute.xlu1 %750 }
 0x1c0   :  { %v3376_v23 = vpop.permute.xlu0 %746 }
 0x1c2   :  { %v3378_v31 = vpop.permute.xlu1 %684 }
 0x1c3   :  { %4304 = vst [vmem:[#allocation4_spill] sm:$0xff] %v3378_v31 }
 0x1c4   :  { %v3380_v53 = vpop.permute.xlu0 %680 }
 0x1c5   :  { %4305 = vst [vmem:[#allocation5_spill] sm:$0xff] %v3380_v53 }
 0x28b   :  { %v3298_v59 = vpop.f32.mrb[2].mxu0 }
 0x28c   :  { %v3300_v60 = vpop.f32.mrb[3].mxu0  ;;  %v386_v61 = vrot.slane %v3298_v59, %v3296_v58  ;;  %v379_v9 = vcombine.high %v3298_v59, %v3298_v59 }
 0x28d   :  { %v337_v62 = vrot.slane %v3300_v60, %v3296_v58  ;;  %v330_v63 = vcombine.high %v3300_v60, %v3300_v60 }
 0x28e   :  { %v402_v0 = vrot.slane %v386_v61, %v3296_v58  ;;  %v394_v1 = vcombine.high %v386_v61, %v386_v61  ;;  %v393_v15 = vrot.slane %v379_v9, %v3296_v58  ;;  %v996_v61 = vld [vmem:[%s4275_s8 + $0x10] sm:$0xff] }
 0x28f   :  { %v353_v2 = vrot.slane %v337_v62, %v3296_v58  ;;  %v344_v4 = vrot.slane %v330_v63, %v3296_v58  ;;  %v345_v5 = vcombine.high %v337_v62, %v337_v62  ;;  %v3391_v62 = vpop.permute.xlu1 %761  ;;  %v3051_v63 = vpack.c.bf16 %v995_v57, %v994_v56 }
 0x290   :  { %v463_v3 = vrot.slane %v402_v0, %v3258_v25  ;;  %v416_v8 = vrot.slane %v394_v1, %v3296_v58  ;;  %v424_v14 = vcombine.high %v402_v0, %v402_v0  ;;  %v409_v20 = vrot.slane %v393_v15, %v3296_v58  ;;  %v997_v0 = vld [vmem:[%s4275_s8 + $0x18] sm:$0xff]  ;;  %v3396_v1 = vpop.permute.xlu0 %757 }
 0x291   :  { %v431_v6 = vrot.slane %v353_v2, %v3258_v25  ;;  %v375_v7 = vcombine.high %v353_v2, %v353_v2  ;;  %v360_v11 = vrot.slane %v344_v4, %v3296_v58  ;;  %v367_v12 = vrot.slane %v345_v5, %v3296_v58  ;;  %3052 = vmatprep.subr.bf16.mxu1 %v3051_v63 }
 0x292   :  { %508 = vrot.lane.b32.xlu1 %v463_v3, %s3136_s5  ;;  %v467_v13 = vrot.slane %v416_v8, %v3258_v25  ;;  %v346_v18 = vcombine.high %v344_v4, %v344_v4  ;;  %v471_v19 = vrot.slane %v424_v14, %v3258_v25  ;;  %v395_v24 = vcombine.high %v393_v15, %v393_v15  ;;  %v998_v3 = vld [vmem:[%s4275_s8 + $0x20] sm:$0xff]  ;;  %v999_v4 = vld [vmem:[%s4275_s8 + $0x28] sm:$0xff] }
 0x293   :  { %492 = vrot.lane.b32.xlu0 %v431_v6, %s3136_s5  ;;  %v439_v10 = vrot.slane %v375_v7, %v3258_v25  ;;  %v447_v16 = vrot.slane %v360_v11, %v3258_v25  ;;  %v377_v17 = vcombine.high %v367_v12, %v367_v12  ;;  %v479_v26 = vrot.slane %v409_v20, %v3258_v25  ;;  %v3404_v6 = vpop.permute.xlu1 %695 }
 0x294   :  { %v374_v22 = vrot.slane %v346_v18, %v3296_v58  ;;  %v376_v28 = vcombine.high %v360_v11, %v360_v11  ;;  %v423_v29 = vrot.slane %v395_v24, %v3296_v58  ;;  %v435_v30 = vrot.slane %v367_v12, %v3258_v25  ;;  %3054 = vmatpush3.bf16.msra.mxu1 %v3051_v63  ;;  %v3406_v7 = vpop.permute.xlu0 %691 }
 0x295   :  { %v443_v21 = vrot.slane %v377_v17, %v3258_v25  ;;  %v426_v32 = vcombine.high %v416_v8, %v416_v8  ;;  %v425_v39 = vcombine.high %v409_v20, %v409_v20  ;;  %v3055_v2 = vpack.c.bf16 %v997_v0, %v996_v61  ;;  %v3435_v20 = vld [vmem:[%s4276_s7] ss:$0 sm:$0xff] }
 0x296   :  { %496 = vrot.lane.b32.xlu1 %v439_v10, %s3136_s5  ;;  %v451_v27 = vrot.slane %v374_v22, %v3258_v25  ;;  %v455_v33 = vrot.slane %v376_v28, %v3258_v25  ;;  %v427_v34 = vcombine.high %v423_v29, %v423_v29  ;;  %v378_v37 = vcombine.high %v374_v22, %v374_v22 }
 0x297   :  { %510 = vrot.lane.b32.xlu0 %v467_v13, %s3136_s5  ;;  %v475_v35 = vrot.slane %v426_v32, %v3258_v25  ;;  %v483_v38 = vrot.slane %v423_v29, %v3258_v25  ;;  %v487_v41 = vrot.slane %v425_v39, %v3258_v25  ;;  %3056 = vmatprep.subr.bf16.mxu1 %v3055_v2  ;;  %v3408_v8 = vpop.permute.xlu1 %772 }
 0x298   :  { %v491_v36 = vrot.slane %v427_v34, %v3258_v25  ;;  %v459_v40 = vrot.slane %v378_v37, %v3258_v25  ;;  %v3059_v5 = vpack.c.bf16 %v999_v4, %v998_v3  ;;  %3058 = vmatpush3.bf16.msra.mxu1 %v3055_v2  ;;  %4306 = vst [vmem:[#allocation6_spill] sm:$0xff] %v3408_v8  ;;  %v3410_v9 = vpop.permute.xlu0 %768 }
 0x299   :  { %4307 = vst [vmem:[#allocation7_spill] sm:$0xff] %v3410_v9 }
 0x29a   :  { %500 = vrot.lane.b32.xlu1 %v447_v16, %s3136_s5  ;;  %3060 = vmatprep.subr.bf16.mxu1 %v3059_v5 }
 0x29b   :  { %512 = vrot.lane.b32.xlu0 %v471_v19, %s3136_s5  ;;  %v3412_v10 = vpop.permute.xlu1 %706 }
 0x29c   :  { %3062 = vmatpush3.bf16.msra.mxu1 %v3059_v5  ;;  %4308 = vst [vmem:[#allocation8_spill] sm:$0xff] %v3412_v10  ;;  %v3414_v11 = vpop.permute.xlu0 %702 }
 0x29d   :  { %4309 = vst [vmem:[#allocation9_spill] sm:$0xff] %v3414_v11 }
 0x29e   :  { %498 = vrot.lane.b32.xlu1 %v443_v21, %s3136_s5 }
 0x29f   :  { %516 = vrot.lane.b32.xlu0 %v479_v26, %s3136_s5  ;;  %v3416_v12 = vpop.permute.xlu1 %783 }
 0x2a0   :  { %4310 = vst [vmem:[#allocation10_spill] sm:$0xff] %v3416_v12  ;;  %v3418_v13 = vpop.permute.xlu0 %779 }
 0x2a1   :  { %4311 = vst [vmem:[#allocation11_spill] sm:$0xff] %v3418_v13 }
 0x2a2   :  { %502 = vrot.lane.b32.xlu1 %v451_v27, %s3136_s5 }
 0x2a3   :  { %494 = vrot.lane.b32.xlu0 %v435_v30, %s3136_s5  ;;  %v3420_v14 = vpop.permute.xlu1 %717 }
 0x2a4   :  { %4312 = vst [vmem:[#allocation12_spill] sm:$0xff] %v3420_v14  ;;  %v3422_v15 = vpop.permute.xlu0 %713 }
 0x2a5   :  { %4313 = vst [vmem:[#allocation13_spill] sm:$0xff] %v3422_v15 }
 0x2a6   :  { %504 = vrot.lane.b32.xlu1 %v455_v33, %s3136_s5 }
 0x2a7   :  { %514 = vrot.lane.b32.xlu0 %v475_v35, %s3136_s5  ;;  %v3424_v16 = vpop.permute.xlu1 %794 }
 0x2a8   :  { %v3426_v17 = vpop.permute.xlu0 %790 }
 0x2aa   :  { %522 = vrot.lane.b32.xlu1 %v491_v36, %s3136_s5 }
 0x2ab   :  { %518 = vrot.lane.b32.xlu0 %v483_v38, %s3136_s5  ;;  %v3428_v18 = vpop.permute.xlu1 %728 }
 0x2ac   :  { %v3430_v19 = vpop.permute.xlu0 %724 }
 0x2ae   :  { %506 = vrot.lane.b32.xlu1 %v459_v40, %s3136_s5 }
 0x2af   :  { %520 = vrot.lane.b32.xlu0 %v487_v41, %s3136_s5 }
 0x2b2   :  { %805 = vbcast.lane.b32.xlu1 %v799_v42, 264 }
 0x2b3   :  { %801 = vbcast.lane.b32.xlu0 %v799_v42, 256 }
 0x2b6   :  { %816 = vbcast.lane.b32.xlu1 %v810_v46, 264 }
 0x2b7   :  { %812 = vbcast.lane.b32.xlu0 %v810_v46, 256 }
 0x304   :  { %v509_v21 = vpop.permute.xlu1 %508 }
 0x305   :  { %v556_v22 = vadd.f32 %v509_v21, %v3300_v60  ;;  %v557_v24 = vadd.f32 %v3298_v59, %v509_v21  ;;  %v493_v26 = vpop.permute.xlu0 %492 }
 0x306   :  { %v540_v27 = vadd.f32 %v493_v26, %v3300_v60  ;;  %v541_v28 = vadd.f32 %v3298_v59, %v493_v26 }
 0x307   :  { %v594_v29 = vadd.f32 %v3435_v20, %v556_v22  ;;  %v595_v30 = vadd.f32 %v3435_v20, %v557_v24 }
 0x308   :  { %v578_v32 = vadd.f32 %v3435_v20, %v540_v27  ;;  %v579_v33 = vadd.f32 %v3435_v20, %v541_v28  ;;  %v497_v34 = vpop.permute.xlu1 %496 }
 0x309   :  { %v626_v35 = vmax.f32 %v594_v29, 0.0  ;;  %v627_v36 = vmax.f32 %v595_v30, 0.0  ;;  %v544_v37 = vadd.f32 %v497_v34, %v3300_v60  ;;  %v545_v38 = vadd.f32 %v3298_v59, %v497_v34  ;;  %v511_v39 = vpop.permute.xlu0 %510 }
 0x30a   :  { %v610_v40 = vmax.f32 %v578_v32, 0.0  ;;  %v611_v41 = vmax.f32 %v579_v33, 0.0  ;;  %v558_v42 = vadd.f32 %v511_v39, %v3300_v60  ;;  %v559_v46 = vadd.f32 %v3298_v59, %v511_v39 }
 0x30b   :  { %v834_v56 = vmul.f32 %v3372_v54, %v626_v35  ;;  %v835_v57 = vmul.f32 %v3370_v50, %v627_v36  ;;  %v582_v61 = vadd.f32 %v3435_v20, %v544_v37  ;;  %v583_v63 = vadd.f32 %v3435_v20, %v545_v38 }
 0x30c   :  { %v818_v0 = vmul.f32 %v3355_v44, %v610_v40  ;;  %v819_v2 = vmul.f32 %v3357_v45, %v611_v41  ;;  %v596_v3 = vadd.f32 %v3435_v20, %v558_v42  ;;  %v597_v4 = vadd.f32 %v3435_v20, %v559_v46  ;;  %v501_v26 = vpop.permute.xlu1 %500 }
 0x30d   :  { %v922_v5 = vsel %vm158_vm2, %v834_v56, 0.0  ;;  %v923_v21 = vsel %vm158_vm2, %v835_v57, 0.0  ;;  %v614_v22 = vmax.f32 %v582_v61, 0.0  ;;  %v615_v24 = vmax.f32 %v583_v63, 0.0  ;;  %v513_v40 = vpop.permute.xlu0 %512 }
 0x30e   :  { %v924_v27 = vadd.f32 %v923_v21, %v922_v5  ;;  %v850_v28 = vsel %vm158_vm2, %v818_v0, 0.0  ;;  %v851_v29 = vsel %vm158_vm2, %v819_v2, 0.0  ;;  %v628_v30 = vmax.f32 %v596_v3, 0.0 }
 0x30f   :  { %v852_v32 = vadd.f32 %v851_v29, %v850_v28  ;;  %v822_v33 = vmul.f32 %v3368_v43, %v614_v22  ;;  %v823_v34 = vmul.f32 %v3366_v49, %v615_v24  ;;  %v629_v35 = vmax.f32 %v597_v4, 0.0 }
 0x310   :  { %v925_v36 = vrot.slane %v924_v27, 4  ;;  %v836_v37 = vmul.f32 %v3376_v23, %v628_v30  ;;  %v548_v38 = vadd.f32 %v501_v26, %v3300_v60  ;;  %v549_v39 = vadd.f32 %v3298_v59, %v501_v26 }
 0x311   :  { %v853_v41 = vrot.slane %v852_v32, 4  ;;  %v868_v42 = vsel %vm158_vm2, %v822_v33, 0.0  ;;  %v869_v46 = vsel %vm158_vm2, %v823_v34, 0.0  ;;  %v837_v56 = vmul.f32 %v3374_v55, %v629_v35  ;;  %v499_v33 = vpop.permute.xlu1 %498 }
 0x312   :  { %v926_v57 = vadd.f32 %v925_v36, %v924_v27  ;;  %v870_v61 = vadd.f32 %v869_v46, %v868_v42  ;;  %v931_v63 = vsel %vm158_vm2, %v836_v37, 0.0  ;;  %v586_v0 = vadd.f32 %v3435_v20, %v548_v38  ;;  %v517_v42 = vpop.permute.xlu0 %516 }
 0x313   :  { %v854_v2 = vadd.f32 %v853_v41, %v852_v32  ;;  %v932_v3 = vsel %vm158_vm2, %v837_v56, 0.0  ;;  %v587_v4 = vadd.f32 %v3435_v20, %v549_v39  ;;  %v560_v5 = vadd.f32 %v513_v40, %v3300_v60 }
 0x314   :  { %v927_v21 = vrot.slane %v926_v57, 2  ;;  %v871_v22 = vrot.slane %v870_v61, 4  ;;  %v933_v24 = vadd.f32 %v932_v3, %v931_v63  ;;  %v618_v26 = vmax.f32 %v586_v0, 0.0 }
 0x315   :  { %v855_v28 = vrot.slane %v854_v2, 2  ;;  %v619_v29 = vmax.f32 %v587_v4, 0.0  ;;  %v561_v27 = vadd.f32 %v3298_v59, %v513_v40  ;;  %v598_v30 = vadd.f32 %v3435_v20, %v560_v5 }
 0x316   :  { %v928_v34 = vadd.f32 %v927_v21, %v926_v57  ;;  %v872_v35 = vadd.f32 %v871_v22, %v870_v61  ;;  %v934_v32 = vrot.slane %v933_v24, 4  ;;  %v826_v36 = vmul.f32 %v3406_v7, %v618_v26 }
 0x317   :  { %v856_v37 = vadd.f32 %v855_v28, %v854_v2  ;;  %v827_v38 = vmul.f32 %v3404_v6, %v619_v29  ;;  %v599_v39 = vadd.f32 %v3435_v20, %v561_v27  ;;  %v630_v41 = vmax.f32 %v598_v30, 0.0 }
 0x318   :  { %v929_v46 = vrot.slane %v928_v34, 1  ;;  %v873_v56 = vrot.slane %v872_v35, 2  ;;  %v935_v63 = vadd.f32 %v934_v32, %v933_v24  ;;  %v886_v40 = vsel %vm158_vm2, %v826_v36, 0.0  ;;  %v503_v24 = vpop.permute.xlu1 %502 }
 0x319   :  { %v887_v0 = vsel %vm158_vm2, %v827_v38, 0.0  ;;  %v631_v3 = vmax.f32 %v599_v39, 0.0  ;;  %v838_v57 = vmul.f32 %v3396_v1, %v630_v41  ;;  %v857_v61 = vrot.slane %v856_v37, 1  ;;  %v495_v39 = vpop.permute.xlu0 %494 }
 0x31a   :  { %v874_v4 = vadd.f32 %v873_v56, %v872_v35  ;;  %v936_v5 = vrot.slane %v935_v63, 2  ;;  %v888_v2 = vadd.f32 %v887_v0, %v886_v40  ;;  %v3482_v21 = vadd.f32 %v929_v46, %v928_v34 }
 0x31b   :  { %v839_v22 = vmul.f32 %v3391_v62, %v631_v3  ;;  %v940_v26 = vsel %vm158_vm2, %v838_v57, 0.0  ;;  %v546_v28 = vadd.f32 %v499_v33, %v3300_v60  ;;  %v547_v32 = vadd.f32 %v3298_v59, %v499_v33 }
 0x31c   :  { %v875_v29 = vrot.slane %v874_v4, 1  ;;  %v937_v27 = vadd.f32 %v936_v5, %v935_v63  ;;  %v889_v30 = vrot.slane %v888_v2, 4  ;;  %v564_v38 = vadd.f32 %v517_v42, %v3300_v60 }
 0x31d   :  { %v941_v36 = vsel %vm158_vm2, %v839_v22, 0.0  ;;  %v584_v35 = vadd.f32 %v3435_v20, %v546_v28  ;;  %v565_v34 = vadd.f32 %v3298_v59, %v517_v42  ;;  %v3492_v41 = vadd.f32 %v857_v61, %v856_v37 }
 0x31e   :  { %v938_v46 = vrot.slane %v937_v27, 1  ;;  %v890_v56 = vadd.f32 %v889_v30, %v888_v2  ;;  %v942_v40 = vadd.f32 %v941_v36, %v940_v26  ;;  %v585_v0 = vadd.f32 %v3435_v20, %v547_v32  ;;  %v505_v26 = vpop.permute.xlu1 %504 }
 0x31f   :  { %v616_v63 = vmax.f32 %v584_v35, 0.0  ;;  %v602_v3 = vadd.f32 %v3435_v20, %v564_v38  ;;  %v603_v33 = vadd.f32 %v3435_v20, %v565_v34  ;;  %v3497_v57 = vadd.f32 %v875_v29, %v874_v4  ;;  %v515_v34 = vpop.permute.xlu0 %514 }
 0x320   :  { %v3499_v5 = vadd.f32 %v938_v46, %v937_v27  ;;  %v943_v22 = vrot.slane %v942_v40, 4  ;;  %v550_v42 = vadd.f32 %v503_v24, %v3300_v60  ;;  %v617_v28 = vmax.f32 %v585_v0, 0.0 }
 0x321   :  { %v824_v37 = vmul.f32 %v3380_v53, %v616_v63  ;;  %v634_v61 = vmax.f32 %v602_v3, 0.0  ;;  %v635_v2 = vmax.f32 %v603_v33, 0.0  ;;  %v891_v30 = vrot.slane %v890_v56, 2 }
 0x322   :  { %v944_v32 = vadd.f32 %v943_v22, %v942_v40  ;;  %v551_v36 = vadd.f32 %v3298_v59, %v503_v24  ;;  %v588_v35 = vadd.f32 %v3435_v20, %v550_v42  ;;  %v825_v4 = vmul.f32 %v3378_v31, %v617_v28 }
 0x323   :  { %v877_v29 = vsel %vm158_vm2, %v824_v37, 0.0  ;;  %v842_v27 = vmul.f32 %v3418_v13, %v634_v61  ;;  %v843_v38 = vmul.f32 %v3416_v12, %v635_v2  ;;  %v542_v3 = vadd.f32 %v495_v39, %v3300_v60 }
 0x324   :  { %v945_v46 = vrot.slane %v944_v32, 2  ;;  %v589_v0 = vadd.f32 %v3435_v20, %v551_v36  ;;  %v620_v63 = vmax.f32 %v588_v35, 0.0  ;;  %v878_v40 = vsel %vm158_vm2, %v825_v4, 0.0  ;;  %v523_v4 = vpop.permute.xlu1 %522 }
 0x325   :  { %v958_v24 = vsel %vm158_vm2, %v842_v27, 0.0  ;;  %v959_v33 = vsel %vm158_vm2, %v843_v38, 0.0  ;;  %v543_v22 = vadd.f32 %v3298_v59, %v495_v39  ;;  %v879_v28 = vadd.f32 %v878_v40, %v877_v29 }
 0x326   :  { %v3515_v42 = vadd.f32 %v945_v46, %v944_v32  ;;  %v960_v37 = vadd.f32 %v959_v33, %v958_v24  ;;  %v621_v61 = vmax.f32 %v589_v0, 0.0  ;;  %v828_v2 = vmul.f32 %v3414_v11, %v620_v63  ;;  %v519_v63 = vpop.permute.xlu0 %518 }
 0x327   :  { %v580_v36 = vadd.f32 %v3435_v20, %v542_v3  ;;  %v581_v35 = vadd.f32 %v3435_v20, %v543_v22  ;;  %v552_v49 = vadd.f32 %v505_v26, %v3300_v60  ;;  %v3521_v43 = vadd.f32 %v891_v30, %v890_v56 }
 0x328   :  { %v880_v27 = vrot.slane %v879_v28, 4  ;;  %v961_v38 = vrot.slane %v960_v37, 4  ;;  %v829_v39 = vmul.f32 %v3412_v10, %v621_v61  ;;  %v895_v32 = vsel %vm158_vm2, %v828_v2, 0.0 }
 0x329   :  { %v612_v29 = vmax.f32 %v580_v36, 0.0  ;;  %v613_v46 = vmax.f32 %v581_v35, 0.0  ;;  %v553_v0 = vadd.f32 %v3298_v59, %v505_v26  ;;  %v590_v61 = vadd.f32 %v3435_v20, %v552_v49 }
 0x32a   :  { %v881_v40 = vadd.f32 %v880_v27, %v879_v28  ;;  %v962_v24 = vadd.f32 %v961_v38, %v960_v37  ;;  %v896_v33 = vsel %vm158_vm2, %v829_v39, 0.0  ;;  %v562_v26 = vadd.f32 %v515_v34, %v3300_v60  ;;  %v507_v27 = vpop.permute.xlu1 %506  ;;  %v521_v11 = vpop.permute.xlu0 %520 }
 0x32b   :  { %v897_v22 = vadd.f32 %v896_v33, %v895_v32  ;;  %v820_v56 = vmul.f32 %v3362_v47, %v612_v29  ;;  %v821_v30 = vmul.f32 %v3364_v48, %v613_v46  ;;  %v591_v36 = vadd.f32 %v3435_v20, %v553_v0 }
 0x32c   :  { %v882_v10 = vrot.slane %v881_v40, 2  ;;  %v963_v2 = vrot.slane %v962_v24, 2  ;;  %v622_v37 = vmax.f32 %v590_v61, 0.0  ;;  %v563_v0 = vadd.f32 %v3298_v59, %v515_v34 }
 0x32d   :  { %v898_v35 = vrot.slane %v897_v22, 4  ;;  %v859_v3 = vsel %vm158_vm2, %v820_v56, 0.0  ;;  %v860_v28 = vsel %vm158_vm2, %v821_v30, 0.0  ;;  %v623_v29 = vmax.f32 %v591_v36, 0.0 }
 0x32e   :  { %v3535_v38 = vadd.f32 %v882_v10, %v881_v40  ;;  %v3537_v39 = vadd.f32 %v963_v2, %v962_v24  ;;  %v861_v32 = vadd.f32 %v860_v28, %v859_v3  ;;  %v830_v46 = vmul.f32 %v3422_v15, %v622_v37  ;;  %v3555_v56 = vpop.permute.xlu1 %805 }
 0x32f   :  { %v3539_v49 = vadd.f32 %v898_v35, %v897_v22  ;;  %v600_v33 = vadd.f32 %v3435_v20, %v562_v26  ;;  %v831_v61 = vmul.f32 %v3420_v14, %v623_v29  ;;  %v570_v10 = vadd.f32 %v523_v4, %v3300_v60 }
 0x330   :  { %v862_v30 = vrot.slane %v861_v32, 4  ;;  %v904_v3 = vsel %vm158_vm2, %v830_v46, 0.0  ;;  %v601_v24 = vadd.f32 %v3435_v20, %v563_v0  ;;  %v571_v36 = vadd.f32 %v3298_v59, %v523_v4 }
 0x331   :  { %v632_v22 = vmax.f32 %v600_v33, 0.0  ;;  %v905_v34 = vsel %vm158_vm2, %v831_v61, 0.0  ;;  %v608_v26 = vadd.f32 %v3435_v20, %v570_v10  ;;  %v566_v29 = vadd.f32 %v519_v63, %v3300_v60  ;;  %v3562_v10 = vpop.permute.xlu0 %801 }
 0x332   :  { %v863_v2 = vadd.f32 %v862_v30, %v861_v32  ;;  %v906_v35 = vadd.f32 %v905_v34, %v904_v3  ;;  %v633_v28 = vmax.f32 %v601_v24, 0.0  ;;  %v609_v46 = vadd.f32 %v3435_v20, %v571_v36 }
 0x333   :  { %v840_v37 = vmul.f32 %v3410_v9, %v632_v22  ;;  %v640_v0 = vmax.f32 %v608_v26, 0.0  ;;  %v567_v32 = vadd.f32 %v3298_v59, %v519_v63  ;;  %v604_v61 = vadd.f32 %v3435_v20, %v566_v29 }
 0x334   :  { %v864_v40 = vrot.slane %v863_v2, 2  ;;  %v907_v33 = vrot.slane %v906_v35, 4  ;;  %v841_v30 = vmul.f32 %v3408_v8, %v633_v28  ;;  %v641_v24 = vmax.f32 %v609_v46, 0.0 }
 0x335   :  { %v949_v4 = vsel %vm158_vm2, %v840_v37, 0.0  ;;  %v605_v22 = vadd.f32 %v3435_v20, %v567_v32  ;;  %v554_v34 = vadd.f32 %v507_v27, %v3300_v60  ;;  %v636_v63 = vmax.f32 %v604_v61, 0.0 }
 0x336   :  { %v865_v3 = vadd.f32 %v864_v40, %v863_v2  ;;  %v3566_v9 = vadd.f32 %v907_v33, %v906_v35  ;;  %v950_v36 = vsel %vm158_vm2, %v841_v30, 0.0  ;;  %v555_v26 = vadd.f32 %v3298_v59, %v507_v27  ;;  %v3575_v35 = vpop.permute.xlu1 %816 }
 0x337   :  { %v951_v8 = vadd.f32 %v950_v36, %v949_v4  ;;  %v637_v37 = vmax.f32 %v605_v22, 0.0  ;;  %v592_v29 = vadd.f32 %v3435_v20, %v554_v34  ;;  %v844_v14 = vmul.f32 %v3426_v17, %v636_v63  ;;  %v3581_v36 = vpop.permute.xlu0 %812 }
 0x338   :  { %v866_v28 = vrot.slane %v865_v3, 1  ;;  %v593_v40 = vadd.f32 %v3435_v20, %v555_v26  ;;  %v568_v2 = vadd.f32 %v521_v11, %v3300_v60  ;;  %v569_v46 = vadd.f32 %v3298_v59, %v521_v11 }
 0x339   :  { %v952_v33 = vrot.slane %v951_v8, 4  ;;  %v845_v30 = vmul.f32 %v3424_v16, %v637_v37  ;;  %v624_v27 = vmax.f32 %v592_v29, 0.0  ;;  %v967_v4 = vsel %vm158_vm2, %v844_v14, 0.0 }
 0x33a   :  { %v867_v32 = vadd.f32 %v866_v28, %v865_v3  ;;  %v625_v61 = vmax.f32 %v593_v40, 0.0  ;;  %v606_v22 = vadd.f32 %v3435_v20, %v568_v2  ;;  %v607_v34 = vadd.f32 %v3435_v20, %v569_v46 }
 0x33b   :  { %v953_v60 = vadd.f32 %v952_v33, %v951_v8  ;;  %v968_v59 = vsel %vm158_vm2, %v845_v30, 0.0  ;;  %v832_v11 = vmul.f32 %v3430_v19, %v624_v27  ;;  %v849_v3 = vmul.f32 %v3575_v35, %v641_v24 }
 0x33c   :  { %v969_v63 = vadd.f32 %v968_v59, %v967_v4  ;;  %v833_v14 = vmul.f32 %v3428_v18, %v625_v61  ;;  %v638_v26 = vmax.f32 %v606_v22, 0.0  ;;  %v639_v28 = vmax.f32 %v607_v34, 0.0 }
 0x33d   :  { %v954_v37 = vrot.slane %v953_v60, 2  ;;  %v913_v20 = vsel %vm158_vm2, %v832_v11, 0.0  ;;  %v986_v29 = vsel %vm158_vm2, %v849_v3, 0.0  ;;  %v848_v8 = vmul.f32 %v3581_v36, %v640_v0 }
 0x33e   :  { %v970_v40 = vrot.slane %v969_v63, 4  ;;  %v914_v2 = vsel %vm158_vm2, %v833_v14, 0.0  ;;  %v847_v24 = vmul.f32 %v3555_v56, %v639_v28  ;;  %v846_v46 = vmul.f32 %v3562_v10, %v638_v26 }
 0x33f   :  { %v955_v33 = vadd.f32 %v954_v37, %v953_v60  ;;  %v915_v30 = vadd.f32 %v914_v2, %v913_v20  ;;  %v985_v27 = vsel %vm158_vm2, %v848_v8, 0.0  ;;  %v4314_v4 = vrot.slane %v3535_v38, 1 }
 0x340   :  { %v971_v22 = vadd.f32 %v970_v40, %v969_v63  ;;  %v977_v0 = vsel %vm158_vm2, %v847_v24, 0.0  ;;  %v976_v34 = vsel %vm158_vm2, %v846_v46, 0.0  ;;  %v987_v59 = vadd.f32 %v986_v29, %v985_v27 }
 0x341   :  { %v885_v61 = vadd.f32 %v4314_v4, %v3535_v38  ;;  %v956_v11 = vrot.slane %v955_v33, 1  ;;  %v916_v3 = vrot.slane %v915_v30, 4  ;;  %v978_v14 = vadd.f32 %v977_v0, %v976_v34 }
 0x342   :  { %v893_v26 = vrot.slane %v3521_v43, 1  ;;  %v972_v60 = vrot.slane %v971_v22, 2  ;;  %v988_v28 = vrot.slane %v987_v59, 4  ;;  %v4315_v37 = vrot.slane %v3539_v49, 2 }
 0x343   :  { %v909_v38 = vrot.slane %v3566_v9, 2  ;;  %v979_v63 = vrot.slane %v978_v14, 4  ;;  %v917_v40 = vadd.f32 %v916_v3, %v915_v30  ;;  %v1020_v29 = vsel %vm1019_vm3, %v867_v32, %v3492_v41 }
 0x344   :  { %v901_v20 = vadd.f32 %v4315_v37, %v3539_v49  ;;  %v894_v8 = vadd.f32 %v893_v26, %v3521_v43  ;;  %v989_v2 = vadd.f32 %v988_v28, %v987_v59  ;;  %v1022_v27 = vsel %vm1021_vm5, %v3497_v57, %v1020_v29  ;;  %v1000_v57 = vld [vmem:[%s4275_s8 + $0x30] sm:$0xff] }
 0x345   :  { %v910_v46 = vadd.f32 %v909_v38, %v3566_v9  ;;  %v4316_v49 = vrot.slane %v3515_v42, 1  ;;  %v980_v0 = vadd.f32 %v979_v63, %v978_v14  ;;  %v918_v34 = vrot.slane %v917_v40, 2 }
 0x346   :  { %v902_v24 = vrot.slane %v901_v20, 1  ;;  %v1024_v37 = vsel %vm1023_vm4, %v885_v61, %v1022_v27  ;;  %v965_v41 = vrot.slane %v3537_v39, 1  ;;  %v973_v9 = vadd.f32 %v972_v60, %v971_v22 }
 0x347   :  { %v948_v4 = vadd.f32 %v4316_v49, %v3515_v42  ;;  %v911_v30 = vrot.slane %v910_v46, 1  ;;  %v1026_v3 = vsel %vm1025_vm6, %v894_v8, %v1024_v37  ;;  %v981_v32 = vrot.slane %v980_v0, 2  ;;  %v1001_v42 = vld [vmem:[%s4275_s8 + $0x38] sm:$0xff] }
 0x348   :  { %v903_v43 = vadd.f32 %v902_v24, %v901_v20  ;;  %v919_v59 = vadd.f32 %v918_v34, %v917_v40  ;;  %v990_v26 = vrot.slane %v989_v2, 2  ;;  %v957_v28 = vadd.f32 %v956_v11, %v955_v33 }
 0x349   :  { %v912_v14 = vadd.f32 %v911_v30, %v910_v46  ;;  %v1033_v20 = vsel %vm1019_vm3, %v3499_v5, %v3482_v21  ;;  %v974_v63 = vrot.slane %v973_v9, 1  ;;  %v982_v22 = vadd.f32 %v981_v32, %v980_v0  ;;  %v2793_v32 = vld [vmem:[%s4271_s6 + $0x28] sm:$0xff] }
 0x34a   :  { %v1028_v61 = vsel %vm1027_vm7, %v903_v43, %v1026_v3  ;;  %v920_v38 = vrot.slane %v919_v59, 1  ;;  %v991_v60 = vadd.f32 %v990_v26, %v989_v2  ;;  %v966_v40 = vadd.f32 %v965_v41, %v3537_v39  ;;  %v2792_v41 = vld [vmem:[%s4271_s6 + $0x20] sm:$0xff]  ;;  %v2795_v26 = vld [vmem:[%s4271_s6 + $0x38] sm:$0xff] }
 0x34b   :  { %v1030_v8 = vsel %vm1029_vm8, %v912_v14, %v1028_v61  ;;  %v1034_v29 = vsel %vm1021_vm5, %v948_v4, %v1033_v20  ;;  %v3063_v24 = vpack.c.bf16 %v1001_v42, %v1000_v57  ;;  %v975_v46 = vadd.f32 %v974_v63, %v973_v9  ;;  %v2789_v42 = vld [vmem:[%s4277_s9] ss:$0 sm:$0xff] }
 0x34c   :  { %v921_v27 = vadd.f32 %v920_v38, %v919_v59  ;;  %v983_v49 = vrot.slane %v982_v22, 1  ;;  %v992_v34 = vrot.slane %v991_v60, 1  ;;  %v1035_v33 = vsel %vm1023_vm4, %v957_v28, %v1034_v29  ;;  %v2794_v59 = vld [vmem:[%s4271_s6 + $0x30] sm:$0xff] }
 0x34d   :  { %3064 = vmatprep.subr.bf16.mxu1 %v3063_v24  ;;  %v1036_v2 = vsel %vm1025_vm6, %v966_v40, %v1035_v33  ;;  %v3067_v9 = vpack.c.bf16 %v2793_v32, %v2792_v41  ;;  %v3071_v57 = vpack.c.bf16 %v2795_v26, %v2794_v59 }
 0x34e   :  { %v1032_v21 = vsel %vm1031_vm9, %v921_v27, %v1030_v8  ;;  %v984_v5 = vadd.f32 %v983_v49, %v982_v22  ;;  %v993_v11 = vadd.f32 %v992_v34, %v991_v60  ;;  %3066 = vmatpush3.bf16.msra.mxu1 %v3063_v24  ;;  %v1037_v39 = vsel %vm1027_vm7, %v975_v46, %v1036_v2 }
 0x34f   :  { %1040 = vrot.lane.b32.xlu0 %v1032_v21, %s3137_s20  ;;  %3068 = vmatprep.subr.bf16.mxu0 %v3067_v9 }
 0x350   :  { %v1038_v4 = vsel %vm1029_vm8, %v984_v5, %v1037_v39  ;;  %3070 = vmatpush3.bf16.msra.mxu0 %v3067_v9 }
 0x351   :  { %v1039_v0 = vsel %vm1031_vm9, %v993_v11, %v1038_v4  ;;  %3072 = vmatprep.subr.bf16.mxu0 %v3071_v57 }
 0x352   :  { %1042 = vrot.lane.b32.xlu1 %v1039_v0, %s3137_s20 }
 0x354   :  { %3074 = vmatpush3.bf16.msra.mxu0 %v3071_v57 }
 0x3c1   :  { %v1041_v37 = vpop.permute.xlu0 %1040 }
 0x3c2   :  { %v1046_v43 = vsel %vm158_vm2, %v3284_v51, %v1041_v37 }
 0x3c3   :  { %2950 = vmatprep.mubr.msk.f32.mxu1 %vm1054_vm10, %v1046_v43 }
 0x3c4   :  { %v1043_v30 = vpop.permute.xlu1 %1042 }
 0x3c5   :  { %v1047_v3 = vsel %vm158_vm2, %v3286_v52, %v1043_v30 }
 0x3c6   :  { %2951 = vmatmul.mubr.msk.f32.vlgmr.msra.gmra.mrb[2].mxu1 %vm1054_vm10, %v1047_v3 }
 0x499   :  { %v2952_v14 = vpop.f32.mrb[2].mxu1 }
 0x49a   :  { %v1133_v61 = vadd.f32 %v2952_v14, %v2789_v42  ;;  %v1127_v28 = vpop.f32.mrb[3].mxu1 }
 0x49b   :  { %v1128_v20 = vadd.f32 %v2789_v42, %v1127_v28 }
 0x49c   :  { %v1137_v38 = vmax.f32 %v1133_v61, 0.0 }
 0x49d   :  { %v1136_v63 = vmax.f32 %v1128_v20, 0.0 }
 0x49e   :  { %v3662_v60 = vadd.f32 %v1137_v38, %v3286_v52 }
 0x49f   :  { %v3659_v22 = vadd.f32 %v1136_v63, %v3284_v51 }
 0x4a1   :  { %2961 = vmatprep.mubr.msk.f32.mxu0 %vm158_vm2, %v3659_v22 }
 0x4a2   :  { %2962 = vmatmul.mubr.msk.f32.vlgmr.msra.gmra.mrb[4].mxu0 %vm158_vm2, %v3662_v60 }
 0x575   :  { %v3668_v8 = vpop.f32.mrb[4].mxu0 }
 0x576   :  { %v3670_v40 = vpop.f32.mrb[5].mxu0  ;;  %v1286_v29 = vrot.slane %v3668_v8, %v3296_v58  ;;  %v1279_v2 = vcombine.high %v3668_v8, %v3668_v8 }
 0x577   :  { %v1237_v51 = vrot.slane %v3670_v40, %v3296_v58  ;;  %v1230_v52 = vcombine.high %v3670_v40, %v3670_v40 }
 0x578   :  { %v1302_v24 = vrot.slane %v1286_v29, %v3296_v58  ;;  %v1294_v27 = vcombine.high %v1286_v29, %v1286_v29  ;;  %v1293_v43 = vrot.slane %v1279_v2, %v3296_v58 }
 0x579   :  { %v1253_v46 = vrot.slane %v1237_v51, %v3296_v58  ;;  %v1245_v49 = vcombine.high %v1237_v51, %v1237_v51  ;;  %v1244_v33 = vrot.slane %v1230_v52, %v3296_v58 }
 0x57a   :  { %v1363_v34 = vrot.slane %v1302_v24, %v3258_v25  ;;  %v1316_v11 = vrot.slane %v1294_v27, %v3296_v58  ;;  %v1324_v37 = vcombine.high %v1302_v24, %v1302_v24  ;;  %v1309_v59 = vrot.slane %v1293_v43, %v3296_v58 }
 0x57b   :  { %v1331_v21 = vrot.slane %v1253_v46, %v3258_v25  ;;  %v1267_v5 = vrot.slane %v1245_v49, %v3296_v58  ;;  %v1260_v4 = vrot.slane %v1244_v33, %v3296_v58  ;;  %v1246_v41 = vcombine.high %v1244_v33, %v1244_v33 }
 0x57c   :  { %1408 = vrot.lane.b32.xlu1 %v1363_v34, %s3136_s5  ;;  %v1367_v0 = vrot.slane %v1316_v11, %v3258_v25  ;;  %v1371_v32 = vrot.slane %v1324_v37, %v3258_v25  ;;  %v1379_v57 = vrot.slane %v1309_v59, %v3258_v25  ;;  %v1275_v42 = vcombine.high %v1253_v46, %v1253_v46  ;;  %v2805_v37 = vld [vmem:[%s4275_s8 + $0x68] sm:$0xff] }
 0x57d   :  { %1392 = vrot.lane.b32.xlu0 %v1331_v21, %s3136_s5  ;;  %v1335_v39 = vrot.slane %v1267_v5, %v3258_v25  ;;  %v1347_v30 = vrot.slane %v1260_v4, %v3258_v25  ;;  %v1277_v3 = vcombine.high %v1267_v5, %v1267_v5  ;;  %v1274_v26 = vrot.slane %v1246_v41, %v3296_v58  ;;  %v2800_v21 = vld [vmem:[%s4275_s8 + $0x40] sm:$0xff]  ;;  %v2801_v5 = vld [vmem:[%s4275_s8 + $0x48] sm:$0xff] }
 0x57e   :  { %v1276_v61 = vcombine.high %v1260_v4, %v1260_v4  ;;  %v1295_v28 = vcombine.high %v1293_v43, %v1293_v43  ;;  %v1339_v20 = vrot.slane %v1275_v42, %v3258_v25  ;;  %v1326_v38 = vcombine.high %v1316_v11, %v1316_v11  ;;  %v2802_v11 = vld [vmem:[%s4275_s8 + $0x50] sm:$0xff] }
 0x57f   :  { %v1343_v9 = vrot.slane %v1277_v3, %v3258_v25  ;;  %v1351_v14 = vrot.slane %v1274_v26, %v3258_v25  ;;  %v1278_v29 = vcombine.high %v1274_v26, %v1274_v26  ;;  %v1325_v49 = vcombine.high %v1309_v59, %v1309_v59 }
 0x580   :  { %1394 = vrot.lane.b32.xlu1 %v1335_v39, %s3136_s5  ;;  %v1355_v63 = vrot.slane %v1276_v61, %v3258_v25  ;;  %v1323_v51 = vrot.slane %v1295_v28, %v3296_v58  ;;  %v1375_v52 = vrot.slane %v1326_v38, %v3258_v25  ;;  %v3075_v2 = vpack.c.bf16 %v2801_v5, %v2800_v21  ;;  %v2803_v39 = vld [vmem:[%s4275_s8 + $0x58] sm:$0xff] }
 0x581   :  { %1410 = vrot.lane.b32.xlu0 %v1367_v0, %s3136_s5  ;;  %v1359_v24 = vrot.slane %v1278_v29, %v3258_v25  ;;  %v1387_v33 = vrot.slane %v1325_v49, %v3258_v25  ;;  %v3079_v4 = vpack.c.bf16 %v2803_v39, %v2802_v11  ;;  %v2804_v0 = vld [vmem:[%s4275_s8 + $0x60] sm:$0xff] }
 0x582   :  { %v1327_v27 = vcombine.high %v1323_v51, %v1323_v51  ;;  %v1383_v46 = vrot.slane %v1323_v51, %v3258_v25  ;;  %3076 = vmatprep.subr.bf16.mxu0 %v3075_v2  ;;  %v3083_v43 = vpack.c.bf16 %v2805_v37, %v2804_v0 }
 0x583   :  { %3078 = vmatpush3.bf16.msra.mxu0 %v3075_v2 }
 0x584   :  { %1400 = vrot.lane.b32.xlu1 %v1347_v30, %s3136_s5  ;;  %v1391_v34 = vrot.slane %v1327_v27, %v3258_v25  ;;  %3080 = vmatprep.subr.bf16.mxu0 %v3079_v4  ;;  %v3743_v30 = vld [vmem:[%s4276_s7 + $0x1] ss:$0 sm:$0xff] }
 0x585   :  { %1412 = vrot.lane.b32.xlu0 %v1371_v32, %s3136_s5 }
 0x587   :  { %3082 = vmatpush3.bf16.msra.mxu0 %v3079_v4 }
 0x588   :  { %1398 = vrot.lane.b32.xlu1 %v1343_v9, %s3136_s5  ;;  %3084 = vmatprep.subr.bf16.mxu0 %v3083_v43 }
 0x589   :  { %1416 = vrot.lane.b32.xlu0 %v1379_v57, %s3136_s5 }
 0x58b   :  { %3086 = vmatpush3.bf16.msra.mxu0 %v3083_v43 }
 0x58c   :  { %1402 = vrot.lane.b32.xlu1 %v1351_v14, %s3136_s5 }
 0x58d   :  { %1396 = vrot.lane.b32.xlu0 %v1339_v20, %s3136_s5 }
 0x590   :  { %1404 = vrot.lane.b32.xlu1 %v1355_v63, %s3136_s5 }
 0x591   :  { %1414 = vrot.lane.b32.xlu0 %v1375_v52, %s3136_s5 }
 0x594   :  { %1406 = vrot.lane.b32.xlu1 %v1359_v24, %s3136_s5 }
 0x595   :  { %1418 = vrot.lane.b32.xlu0 %v1383_v46, %s3136_s5 }
 0x598   :  { %1422 = vrot.lane.b32.xlu1 %v1391_v34, %s3136_s5 }
 0x599   :  { %1420 = vrot.lane.b32.xlu0 %v1387_v33, %s3136_s5 }
 0x5ee   :  { %v1409_v3 = vpop.permute.xlu1 %1408 }
 0x5ef   :  { %v1456_v41 = vadd.f32 %v1409_v3, %v3670_v40  ;;  %v1457_v32 = vadd.f32 %v3668_v8, %v1409_v3  ;;  %v1393_v59 = vpop.permute.xlu0 %1392 }
 0x5f0   :  { %v1440_v9 = vadd.f32 %v1393_v59, %v3670_v40  ;;  %v1441_v26 = vadd.f32 %v3668_v8, %v1393_v59 }
 0x5f1   :  { %v1494_v57 = vadd.f32 %v3743_v30, %v1456_v41  ;;  %v1495_v42 = vadd.f32 %v3743_v30, %v1457_v32 }
 0x5f2   :  { %v1478_v14 = vadd.f32 %v3743_v30, %v1440_v9  ;;  %v1479_v61 = vadd.f32 %v3743_v30, %v1441_v26  ;;  %v1395_v28 = vpop.permute.xlu1 %1394 }
 0x5f3   :  { %v1526_v20 = vmax.f32 %v1494_v57, 0.0  ;;  %v1527_v38 = vmax.f32 %v1495_v42, 0.0  ;;  %v1442_v63 = vadd.f32 %v1395_v28, %v3670_v40  ;;  %v1443_v29 = vadd.f32 %v3668_v8, %v1395_v28  ;;  %v1411_v51 = vpop.permute.xlu0 %1410 }
 0x5f4   :  { %v1510_v52 = vmax.f32 %v1478_v14, 0.0  ;;  %v1511_v24 = vmax.f32 %v1479_v61, 0.0  ;;  %v1458_v27 = vadd.f32 %v1411_v51, %v3670_v40  ;;  %v1459_v46 = vadd.f32 %v3668_v8, %v1411_v51 }
 0x5f5   :  { %v1558_v49 = vmul.f32 %v1526_v20, %v3372_v54  ;;  %v1559_v34 = vmul.f32 %v1527_v38, %v3370_v50  ;;  %v1480_v33 = vadd.f32 %v3743_v30, %v1442_v63  ;;  %v1481_v21 = vadd.f32 %v3743_v30, %v1443_v29 }
 0x5f6   :  { %v1542_v5 = vmul.f32 %v1510_v52, %v3355_v44  ;;  %v1543_v11 = vmul.f32 %v1511_v24, %v3357_v45  ;;  %v1496_v2 = vadd.f32 %v3743_v30, %v1458_v27  ;;  %v1497_v39 = vadd.f32 %v3743_v30, %v1459_v46  ;;  %v1401_v3 = vpop.permute.xlu1 %1400 }
 0x5f7   :  { %v1646_v4 = vsel %vm158_vm2, %v1558_v49, 0.0  ;;  %v1647_v0 = vsel %vm158_vm2, %v1559_v34, 0.0  ;;  %v1512_v37 = vmax.f32 %v1480_v33, 0.0  ;;  %v1513_v43 = vmax.f32 %v1481_v21, 0.0  ;;  %v1413_v63 = vpop.permute.xlu0 %1412 }
 0x5f8   :  { %v1648_v41 = vadd.f32 %v1647_v0, %v1646_v4  ;;  %v1574_v32 = vsel %vm158_vm2, %v1542_v5, 0.0  ;;  %v1575_v59 = vsel %vm158_vm2, %v1543_v11, 0.0  ;;  %v1528_v9 = vmax.f32 %v1496_v2, 0.0 }
 0x5f9   :  { %v1576_v26 = vadd.f32 %v1575_v59, %v1574_v32  ;;  %v1544_v57 = vmul.f32 %v1512_v37, %v3362_v47  ;;  %v1545_v42 = vmul.f32 %v1513_v43, %v3364_v48  ;;  %v1529_v14 = vmax.f32 %v1497_v39, 0.0 }
 0x5fa   :  { %v1649_v61 = vrot.slane %v1648_v41, 4  ;;  %v1560_v28 = vmul.f32 %v1528_v9, %v3376_v23  ;;  %v1448_v20 = vadd.f32 %v1401_v3, %v3670_v40  ;;  %v1449_v38 = vadd.f32 %v3668_v8, %v1401_v3 }
 0x5fb   :  { %v1577_v29 = vrot.slane %v1576_v26, 4  ;;  %v1583_v51 = vsel %vm158_vm2, %v1544_v57, 0.0  ;;  %v1584_v52 = vsel %vm158_vm2, %v1545_v42, 0.0  ;;  %v1561_v24 = vmul.f32 %v1529_v14, %v3374_v55 }
 0x5fc   :  { %v1650_v27 = vadd.f32 %v1649_v61, %v1648_v41  ;;  %v1585_v46 = vadd.f32 %v1584_v52, %v1583_v51  ;;  %v1655_v49 = vsel %vm158_vm2, %v1560_v28, 0.0  ;;  %v1486_v34 = vadd.f32 %v3743_v30, %v1448_v20  ;;  %v1399_v28 = vpop.permute.xlu1 %1398 }
 0x5fd   :  { %v1578_v33 = vadd.f32 %v1577_v29, %v1576_v26  ;;  %v1656_v21 = vsel %vm158_vm2, %v1561_v24, 0.0  ;;  %v1487_v5 = vadd.f32 %v3743_v30, %v1449_v38  ;;  %v1460_v11 = vadd.f32 %v1413_v63, %v3670_v40 }
 0x5fe   :  { %v1651_v2 = vrot.slane %v1650_v27, 2  ;;  %v1586_v39 = vrot.slane %v1585_v46, 4  ;;  %v1657_v4 = vadd.f32 %v1656_v21, %v1655_v49  ;;  %v1518_v0 = vmax.f32 %v1486_v34, 0.0  ;;  %v1417_v21 = vpop.permute.xlu0 %1416 }
 0x5ff   :  { %v1579_v37 = vrot.slane %v1578_v33, 2  ;;  %v1519_v43 = vmax.f32 %v1487_v5, 0.0  ;;  %v1461_v3 = vadd.f32 %v3668_v8, %v1413_v63  ;;  %v1498_v41 = vadd.f32 %v3743_v30, %v1460_v11 }
 0x600   :  { %v1652_v32 = vadd.f32 %v1651_v2, %v1650_v27  ;;  %v1587_v59 = vadd.f32 %v1586_v39, %v1585_v46  ;;  %v1658_v9 = vrot.slane %v1657_v4, 4  ;;  %v1550_v26 = vmul.f32 %v1518_v0, %v3406_v7 }
 0x601   :  { %v1580_v57 = vadd.f32 %v1579_v37, %v1578_v33  ;;  %v1551_v42 = vmul.f32 %v1519_v43, %v3404_v6  ;;  %v1499_v14 = vadd.f32 %v3743_v30, %v1461_v3  ;;  %v1530_v61 = vmax.f32 %v1498_v41, 0.0 }
 0x602   :  { %v1653_v20 = vrot.slane %v1652_v32, 1  ;;  %v1588_v38 = vrot.slane %v1587_v59, 2  ;;  %v1659_v29 = vadd.f32 %v1658_v9, %v1657_v4  ;;  %v1610_v51 = vsel %vm158_vm2, %v1550_v26, 0.0  ;;  %v1403_v9 = vpop.permute.xlu1 %1402 }
 0x603   :  { %v1581_v63 = vrot.slane %v1580_v57, 1  ;;  %v1611_v52 = vsel %vm158_vm2, %v1551_v42, 0.0  ;;  %v1531_v24 = vmax.f32 %v1499_v14, 0.0  ;;  %v1562_v27 = vmul.f32 %v1530_v61, %v3396_v1 }
 0x604   :  { %v3790_v46 = vadd.f32 %v1653_v20, %v1652_v32  ;;  %v1589_v49 = vadd.f32 %v1588_v38, %v1587_v59  ;;  %v1660_v34 = vrot.slane %v1659_v29, 2  ;;  %v1612_v33 = vadd.f32 %v1611_v52, %v1610_v51 }
 0x605   :  { %v3792_v5 = vadd.f32 %v1581_v63, %v1580_v57  ;;  %v1563_v11 = vmul.f32 %v1531_v24, %v3391_v62  ;;  %v1664_v2 = vsel %vm158_vm2, %v1562_v27, 0.0  ;;  %v1446_v39 = vadd.f32 %v1399_v28, %v3670_v40 }
 0x606   :  { %v1590_v4 = vrot.slane %v1589_v49, 1  ;;  %v1661_v0 = vadd.f32 %v1660_v34, %v1659_v29  ;;  %v1613_v37 = vrot.slane %v1612_v33, 4  ;;  %v1447_v43 = vadd.f32 %v3668_v8, %v1399_v28 }
 0x607   :  { %v1665_v3 = vsel %vm158_vm2, %v1563_v11, 0.0  ;;  %v1484_v41 = vadd.f32 %v3743_v30, %v1446_v39  ;;  %v1464_v32 = vadd.f32 %v1417_v21, %v3670_v40  ;;  %v1465_v59 = vadd.f32 %v3668_v8, %v1417_v21 }
 0x608   :  { %v3802_v26 = vadd.f32 %v1590_v4, %v1589_v49  ;;  %v1662_v57 = vrot.slane %v1661_v0, 1  ;;  %v1614_v42 = vadd.f32 %v1613_v37, %v1612_v33  ;;  %v1666_v14 = vadd.f32 %v1665_v3, %v1664_v2  ;;  %v1397_v33 = vpop.permute.xlu0 %1396 }
 0x609   :  { %v1485_v61 = vadd.f32 %v3743_v30, %v1447_v43  ;;  %v1516_v20 = vmax.f32 %v1484_v41, 0.0  ;;  %v1502_v38 = vadd.f32 %v3743_v30, %v1464_v32  ;;  %v1503_v28 = vadd.f32 %v3743_v30, %v1465_v59 }
 0x60a   :  { %v3807_v29 = vadd.f32 %v1662_v57, %v1661_v0  ;;  %v1615_v51 = vrot.slane %v1614_v42, 2  ;;  %v1667_v63 = vrot.slane %v1666_v14, 4  ;;  %v1450_v52 = vadd.f32 %v1403_v9, %v3670_v40  ;;  %v1405_v57 = vpop.permute.xlu1 %1404 }
 0x60b   :  { %v1517_v24 = vmax.f32 %v1485_v61, 0.0  ;;  %v1548_v27 = vmul.f32 %v1516_v20, %v3380_v53  ;;  %v1534_v49 = vmax.f32 %v1502_v38, 0.0  ;;  %v1535_v34 = vmax.f32 %v1503_v28, 0.0 }
 0x60c   :  { %v3811_v21 = vadd.f32 %v1615_v51, %v1614_v42  ;;  %v1668_v11 = vadd.f32 %v1667_v63, %v1666_v14  ;;  %v1451_v2 = vadd.f32 %v3668_v8, %v1403_v9  ;;  %v1488_v39 = vadd.f32 %v3743_v30, %v1450_v52  ;;  %v4317_v63 = vld [vmem:[#allocation9_spill] sm:$0xff] }
 0x60d   :  { %v1549_v4 = vmul.f32 %v1517_v24, %v3378_v31  ;;  %v1601_v0 = vsel %vm158_vm2, %v1548_v27, 0.0  ;;  %v1566_v37 = vmul.f32 %v1534_v49, %v3418_v13  ;;  %v1567_v43 = vmul.f32 %v1535_v34, %v3416_v12 }
 0x60e   :  { %v1669_v3 = vrot.slane %v1668_v11, 2  ;;  %v1489_v41 = vadd.f32 %v3743_v30, %v1451_v2  ;;  %v1520_v32 = vmax.f32 %v1488_v39, 0.0  ;;  %v1444_v59 = vadd.f32 %v1397_v33, %v3670_v40 }
 0x60f   :  { %v1602_v42 = vsel %vm158_vm2, %v1549_v4, 0.0  ;;  %v1682_v9 = vsel %vm158_vm2, %v1566_v37, 0.0  ;;  %v1683_v14 = vsel %vm158_vm2, %v1567_v43, 0.0  ;;  %v1445_v61 = vadd.f32 %v3668_v8, %v1397_v33  ;;  %v4318_v4 = vld [vmem:[#allocation8_spill] sm:$0xff] }
 0x610   :  { %v1670_v20 = vadd.f32 %v1669_v3, %v1668_v11  ;;  %v1603_v38 = vadd.f32 %v1602_v42, %v1601_v0  ;;  %v1684_v28 = vadd.f32 %v1683_v14, %v1682_v9  ;;  %v1521_v51 = vmax.f32 %v1489_v41, 0.0  ;;  %v1415_v3 = vpop.permute.xlu0 %1414  ;;  %v4319_v14 = vld [vmem:[#allocation3_spill] sm:$0xff] }
 0x611   :  { %v1552_v52 = vmul.f32 %v1520_v32, %v4317_v63  ;;  %v1482_v24 = vadd.f32 %v3743_v30, %v1444_v59  ;;  %v1483_v27 = vadd.f32 %v3743_v30, %v1445_v61  ;;  %v1452_v49 = vadd.f32 %v1405_v57, %v3670_v40  ;;  %v4320_v63 = vld [vmem:[#allocation2_spill] sm:$0xff] }
 0x612   :  { %v1671_v34 = vrot.slane %v1670_v20, 1  ;;  %v1604_v2 = vrot.slane %v1603_v38, 4  ;;  %v1685_v39 = vrot.slane %v1684_v28, 4  ;;  %v1553_v37 = vmul.f32 %v1521_v51, %v4318_v4 }
 0x613   :  { %v1619_v43 = vsel %vm158_vm2, %v1552_v52, 0.0  ;;  %v1514_v33 = vmax.f32 %v1482_v24, 0.0  ;;  %v1515_v11 = vmax.f32 %v1483_v27, 0.0  ;;  %v1453_v0 = vadd.f32 %v3668_v8, %v1405_v57 }
 0x614   :  { %v3832_v41 = vadd.f32 %v1671_v34, %v1670_v20  ;;  %v1605_v32 = vadd.f32 %v1604_v2, %v1603_v38  ;;  %v1686_v59 = vadd.f32 %v1685_v39, %v1684_v28  ;;  %v1620_v42 = vsel %vm158_vm2, %v1553_v37, 0.0  ;;  %v1407_v34 = vpop.permute.xlu1 %1406 }
 0x615   :  { %v1621_v9 = vadd.f32 %v1620_v42, %v1619_v43  ;;  %v1546_v61 = vmul.f32 %v1514_v33, %v4319_v14  ;;  %v1547_v12 = vmul.f32 %v1515_v11, %v4320_v63  ;;  %v1490_v51 = vadd.f32 %v3743_v30, %v1452_v49 }
 0x616   :  { %v1606_v4 = vrot.slane %v1605_v32, 2  ;;  %v1687_v52 = vrot.slane %v1686_v59, 2  ;;  %v1491_v24 = vadd.f32 %v3743_v30, %v1453_v0  ;;  %v1462_v57 = vadd.f32 %v1415_v3, %v3670_v40 }
 0x617   :  { %v1622_v27 = vrot.slane %v1621_v9, 4  ;;  %v1592_v20 = vsel %vm158_vm2, %v1546_v61, 0.0  ;;  %v1593_v38 = vsel %vm158_vm2, %v1547_v12, 0.0  ;;  %v1522_v28 = vmax.f32 %v1490_v51, 0.0  ;;  %v4321_v12 = vld [vmem:[#allocation12_spill] sm:$0xff] }
 0x618   :  { %v3842_v2 = vadd.f32 %v1606_v4, %v1605_v32  ;;  %v3844_v39 = vadd.f32 %v1687_v52, %v1686_v59  ;;  %v1594_v37 = vadd.f32 %v1593_v38, %v1592_v20  ;;  %v1523_v43 = vmax.f32 %v1491_v24, 0.0  ;;  %v1419_v32 = vpop.permute.xlu0 %1418 }
 0x619   :  { %v3846_v49 = vadd.f32 %v1622_v27, %v1621_v9  ;;  %v1554_v33 = vmul.f32 %v1522_v28, %v3422_v15  ;;  %v1463_v11 = vadd.f32 %v3668_v8, %v1415_v3  ;;  %v1500_v0 = vadd.f32 %v3743_v30, %v1462_v57 }
 0x61a   :  { %v1608_v42 = vrot.slane %v3842_v2, 1  ;;  %v1595_v61 = vrot.slane %v1594_v37, 4  ;;  %v1555_v51 = vmul.f32 %v1523_v43, %v4321_v12  ;;  %v1454_v4 = vadd.f32 %v1407_v34, %v3670_v40  ;;  %v4322_v43 = vld [vmem:[#allocation7_spill] sm:$0xff] }
 0x61b   :  { %v1624_v59 = vrot.slane %v3846_v49, 2  ;;  %v1628_v52 = vsel %vm158_vm2, %v1554_v33, 0.0  ;;  %v1501_v9 = vadd.f32 %v3743_v30, %v1463_v11  ;;  %v1532_v24 = vmax.f32 %v1500_v0, 0.0  ;;  %v1423_v0 = vpop.permute.xlu1 %1422 }
 0x61c   :  { %v1596_v27 = vadd.f32 %v1595_v61, %v1594_v37  ;;  %v1629_v3 = vsel %vm158_vm2, %v1555_v51, 0.0  ;;  %v1455_v57 = vadd.f32 %v3668_v8, %v1407_v34  ;;  %v1492_v20 = vadd.f32 %v3743_v30, %v1454_v4  ;;  %v4323_v61 = vld [vmem:[#allocation6_spill] sm:$0xff]  ;;  %v1421_v13 = vpop.permute.xlu0 %1420 }
 0x61d   :  { %v1630_v38 = vadd.f32 %v1629_v3, %v1628_v52  ;;  %v1533_v28 = vmax.f32 %v1501_v9, 0.0  ;;  %v1564_v12 = vmul.f32 %v1532_v24, %v4322_v43  ;;  %v1466_v15 = vadd.f32 %v1419_v32, %v3670_v40 }
 0x61e   :  { %v1597_v63 = vrot.slane %v1596_v27, 2  ;;  %v1493_v14 = vadd.f32 %v3743_v30, %v1455_v57  ;;  %v1524_v33 = vmax.f32 %v1492_v20, 0.0  ;;  %v1467_v11 = vadd.f32 %v3668_v8, %v1419_v32 }
 0x61f   :  { %v1631_v37 = vrot.slane %v1630_v38, 4  ;;  %v1565_v51 = vmul.f32 %v1533_v28, %v4323_v61  ;;  %v1673_v34 = vsel %vm158_vm2, %v1564_v12, 0.0  ;;  %v1504_v4 = vadd.f32 %v3743_v30, %v1466_v15 }
 0x620   :  { %v1598_v52 = vadd.f32 %v1597_v63, %v1596_v27  ;;  %v1525_v9 = vmax.f32 %v1493_v14, 0.0  ;;  %v1556_v24 = vmul.f32 %v1524_v33, %v3430_v19  ;;  %v1505_v3 = vadd.f32 %v3743_v30, %v1467_v11 }
 0x621   :  { %v1632_v43 = vadd.f32 %v1631_v37, %v1630_v38  ;;  %v1674_v57 = vsel %vm158_vm2, %v1565_v51, 0.0  ;;  %v1536_v20 = vmax.f32 %v1504_v4, 0.0  ;;  %v1470_v32 = vadd.f32 %v1423_v0, %v3670_v40 }
 0x622   :  { %v1599_v31 = vrot.slane %v1598_v52, 1  ;;  %v1675_v53 = vadd.f32 %v1674_v57, %v1673_v34  ;;  %v1557_v28 = vmul.f32 %v1525_v9, %v3428_v18  ;;  %v1637_v12 = vsel %vm158_vm2, %v1556_v24, 0.0 }
 0x623   :  { %v1537_v15 = vmax.f32 %v1505_v3, 0.0  ;;  %v1568_v63 = vmul.f32 %v1536_v20, %v3426_v17  ;;  %v1471_v14 = vadd.f32 %v3668_v8, %v1423_v0  ;;  %v1508_v27 = vadd.f32 %v3743_v30, %v1470_v32 }
 0x624   :  { %v1600_v38 = vadd.f32 %v1599_v31, %v1598_v52  ;;  %v1676_v33 = vrot.slane %v1675_v53, 4  ;;  %v1638_v11 = vsel %vm158_vm2, %v1557_v28, 0.0  ;;  %v1468_v37 = vadd.f32 %v1421_v13, %v3670_v40 }
 0x625   :  { %v1639_v51 = vadd.f32 %v1638_v11, %v1637_v12  ;;  %v1569_v34 = vmul.f32 %v1537_v15, %v3424_v16  ;;  %v1691_v4 = vsel %vm158_vm2, %v1568_v63, 0.0  ;;  %v1509_v9 = vadd.f32 %v3743_v30, %v1471_v14 }
 0x626   :  { %v1677_v24 = vadd.f32 %v1676_v33, %v1675_v53  ;;  %v1540_v3 = vmax.f32 %v1508_v27, 0.0  ;;  %v1469_v57 = vadd.f32 %v3668_v8, %v1421_v13  ;;  %v1506_v0 = vadd.f32 %v3743_v30, %v1468_v37 }
 0x627   :  { %v1640_v20 = vrot.slane %v1639_v51, 4  ;;  %v1692_v31 = vsel %vm158_vm2, %v1569_v34, 0.0  ;;  %v1541_v52 = vmax.f32 %v1509_v9, 0.0  ;;  %v1609_v32 = vadd.f32 %v1608_v42, %v3842_v2 }
 0x628   :  { %v1678_v40 = vrot.slane %v1677_v24, 2  ;;  %v1693_v28 = vadd.f32 %v1692_v31, %v1691_v4  ;;  %v1572_v12 = vmul.f32 %v1540_v3, %v3581_v36  ;;  %v1507_v15 = vadd.f32 %v3743_v30, %v1469_v57 }
 0x629   :  { %v1573_v63 = vmul.f32 %v1541_v52, %v3575_v35  ;;  %v1538_v53 = vmax.f32 %v1506_v0, 0.0  ;;  %v1617_v14 = vrot.slane %v3811_v21, 1  ;;  %v1625_v13 = vadd.f32 %v1624_v59, %v3846_v49 }
 0x62a   :  { %v1679_v8 = vadd.f32 %v1678_v40, %v1677_v24  ;;  %v1694_v27 = vrot.slane %v1693_v28, 4  ;;  %v1709_v33 = vsel %vm158_vm2, %v1572_v12, 0.0  ;;  %v1539_v11 = vmax.f32 %v1507_v15, 0.0 }
 0x62b   :  { %v1710_v2 = vsel %vm158_vm2, %v1573_v63, 0.0  ;;  %v1570_v42 = vmul.f32 %v1538_v53, %v3562_v10  ;;  %v1618_v37 = vadd.f32 %v1617_v14, %v3811_v21  ;;  %v1626_v34 = vrot.slane %v1625_v13, 1 }
 0x62c   :  { %v1680_v30 = vrot.slane %v1679_v8, 1  ;;  %v1695_v4 = vadd.f32 %v1694_v27, %v1693_v28  ;;  %v1711_v9 = vadd.f32 %v1710_v2, %v1709_v33  ;;  %v1571_v3 = vmul.f32 %v1539_v11, %v3555_v56 }
 0x62d   :  { %v1700_v57 = vsel %vm158_vm2, %v1570_v42, 0.0  ;;  %v1627_v49 = vadd.f32 %v1626_v34, %v1625_v13  ;;  %v1633_v59 = vrot.slane %v1632_v43, 2  ;;  %v1641_v24 = vadd.f32 %v1640_v20, %v1639_v51 }
 0x62e   :  { %v1696_v0 = vrot.slane %v1695_v4, 2  ;;  %v1712_v31 = vrot.slane %v1711_v9, 4  ;;  %v1701_v52 = vsel %vm158_vm2, %v1571_v3, 0.0  ;;  %v1745_v40 = vsel %vm1019_vm3, %v3802_v26, %v3792_v5  ;;  %v2806_v5 = vld [vmem:[%s4275_s8 + $0x70] sm:$0xff]  ;;  %v2807_v26 = vld [vmem:[%s4275_s8 + $0x78] sm:$0xff] }
 0x62f   :  { %v1702_v21 = vadd.f32 %v1701_v52, %v1700_v57  ;;  %v1634_v12 = vadd.f32 %v1633_v59, %v1632_v43  ;;  %v1642_v15 = vrot.slane %v1641_v24, 2  ;;  %v1746_v28 = vsel %vm1021_vm5, %v1600_v38, %v1745_v40 }
 0x630   :  { %v1747_v63 = vsel %vm1023_vm4, %v1609_v32, %v1746_v28  ;;  %v1681_v53 = vadd.f32 %v1680_v30, %v1679_v8  ;;  %v1689_v14 = vrot.slane %v3844_v39, 1  ;;  %v1697_v13 = vadd.f32 %v1696_v0, %v1695_v4 }
 0x631   :  { %v1703_v51 = vrot.slane %v1702_v21, 4  ;;  %v1635_v20 = vrot.slane %v1634_v12, 1  ;;  %v1643_v27 = vadd.f32 %v1642_v15, %v1641_v24  ;;  %v1748_v33 = vsel %vm1025_vm6, %v1618_v37, %v1747_v63 }
 0x632   :  { %v1749_v43 = vsel %vm1027_vm7, %v1627_v49, %v1748_v33  ;;  %v1690_v38 = vadd.f32 %v1689_v14, %v3844_v39  ;;  %v1698_v32 = vrot.slane %v1697_v13, 1  ;;  %v1713_v8 = vadd.f32 %v1712_v31, %v1711_v9  ;;  %v2812_v14 = vld [vmem:[%s4271_s6 + $0x40] sm:$0xff] }
 0x633   :  { %v1704_v11 = vadd.f32 %v1703_v51, %v1702_v21  ;;  %v1636_v2 = vadd.f32 %v1635_v20, %v1634_v12  ;;  %v1644_v42 = vrot.slane %v1643_v27, 1  ;;  %v1752_v37 = vsel %vm1019_vm3, %v3807_v29, %v3790_v46  ;;  %v2814_v51 = vld [vmem:[%s4271_s6 + $0x50] sm:$0xff] }
 0x634   :  { %v1699_v34 = vadd.f32 %v1698_v32, %v1697_v13  ;;  %v1714_v30 = vrot.slane %v1713_v8, 2  ;;  %v1753_v4 = vsel %vm1021_vm5, %v3832_v41, %v1752_v37  ;;  %v3087_v3 = vpack.c.bf16 %v2807_v26, %v2806_v5  ;;  %v2813_v13 = vld [vmem:[%s4271_s6 + $0x48] sm:$0xff]  ;;  %v2809_v5 = vld [vmem:[%s4277_s9 + $0x1] ss:$0 sm:$0xff] }
 0x635   :  { %v1645_v57 = vadd.f32 %v1644_v42, %v1643_v27  ;;  %v1750_v49 = vsel %vm1029_vm8, %v1636_v2, %v1749_v43  ;;  %v1705_v59 = vrot.slane %v1704_v11, 2  ;;  %v1754_v39 = vsel %vm1023_vm4, %v1681_v53, %v1753_v4  ;;  %v2815_v27 = vld [vmem:[%s4271_s6 + $0x58] sm:$0xff] }
 0x636   :  { %v1715_v9 = vadd.f32 %v1714_v30, %v1713_v8  ;;  %v1755_v24 = vsel %vm1025_vm6, %v1690_v38, %v1754_v39  ;;  %3088 = vmatprep.subr.bf16.mxu0 %v3087_v3  ;;  %v3091_v20 = vpack.c.bf16 %v2813_v13, %v2812_v14  ;;  %v3095_v33 = vpack.c.bf16 %v2815_v27, %v2814_v51 }
 0x637   :  { %v1751_v0 = vsel %vm1031_vm9, %v1645_v57, %v1750_v49  ;;  %v1706_v31 = vadd.f32 %v1705_v59, %v1704_v11  ;;  %v1756_v46 = vsel %vm1027_vm7, %v1699_v34, %v1755_v24  ;;  %3090 = vmatpush3.bf16.msra.mxu0 %v3087_v3 }
 0x638   :  { %1759 = vrot.lane.b32.xlu0 %v1751_v0, %s3137_s20  ;;  %v1716_v29 = vrot.slane %v1715_v9, 1  ;;  %3092 = vmatprep.subr.bf16.mxu1 %v3091_v20 }
 0x639   :  { %v1707_v41 = vrot.slane %v1706_v31, 1  ;;  %3094 = vmatpush3.bf16.msra.mxu1 %v3091_v20 }
 0x63a   :  { %v1717_v40 = vadd.f32 %v1716_v29, %v1715_v9  ;;  %3096 = vmatprep.subr.bf16.mxu1 %v3095_v33 }
 0x63b   :  { %v1708_v52 = vadd.f32 %v1707_v41, %v1706_v31 }
 0x63d   :  { %v1757_v21 = vsel %vm1029_vm8, %v1708_v52, %v1756_v46  ;;  %3098 = vmatpush3.bf16.msra.mxu1 %v3095_v33 }
 0x63e   :  { %v1758_v12 = vsel %vm1031_vm9, %v1717_v40, %v1757_v21 }
 0x63f   :  { %1761 = vrot.lane.b32.xlu1 %v1758_v12, %s3137_s20 }
 0x6aa   :  { %v1760_v15 = vpop.permute.xlu0 %1759 }
 0x6ab   :  { %v1765_v28 = vsel %vm158_vm2, %v3659_v22, %v1760_v15 }
 0x6ac   :  { %2980 = vmatprep.mubr.msk.f32.mxu0 %vm1054_vm10, %v1765_v28 }
 0x6b1   :  { %v1762_v63 = vpop.permute.xlu1 %1761 }
 0x6b2   :  { %v1766_v53 = vsel %vm158_vm2, %v3662_v60, %v1762_v63 }
 0x6b3   :  { %2981 = vmatmul.mubr.msk.f32.vlgmr.msra.gmra.mrb[6].mxu0 %vm1054_vm10, %v1766_v53 }
 0x786   :  { %v2982_v26 = vpop.f32.mrb[6].mxu0 }
 0x787   :  { %v1851_v43 = vadd.f32 %v2982_v26, %v2809_v5  ;;  %v1845_v38 = vpop.f32.mrb[7].mxu0 }
 0x788   :  { %v1846_v32 = vadd.f32 %v2809_v5, %v1845_v38 }
 0x789   :  { %v1855_v8 = vmax.f32 %v1851_v43, 0.0 }
 0x78a   :  { %v1854_v11 = vmax.f32 %v1846_v32, 0.0 }
 0x78b   :  { %v3951_v42 = vadd.f32 %v1855_v8, %v3662_v60 }
 0x78c   :  { %v3948_v2 = vadd.f32 %v1854_v11, %v3659_v22 }
 0x78e   :  { %2991 = vmatprep.mubr.msk.f32.mxu1 %vm158_vm2, %v3948_v2 }
 0x78f   :  { %2992 = vmatmul.mubr.msk.f32.vlgmr.msra.gmra.mrb[4].mxu1 %vm158_vm2, %v3951_v42 }
 0x862   :  { %v3957_v37 = vpop.f32.mrb[4].mxu1 }
 0x863   :  { %v3959_v34 = vpop.f32.mrb[5].mxu1  ;;  %v2004_v30 = vrot.slane %v3957_v37, %v3296_v58  ;;  %v1997_v31 = vcombine.high %v3957_v37, %v3957_v37 }
 0x864   :  { %v1955_v22 = vrot.slane %v3959_v34, %v3296_v58  ;;  %v1948_v60 = vcombine.high %v3959_v34, %v3959_v34 }
 0x865   :  { %v2020_v4 = vrot.slane %v2004_v30, %v3296_v58  ;;  %v2012_v3 = vcombine.high %v2004_v30, %v2004_v30  ;;  %v2011_v40 = vrot.slane %v1997_v31, %v3296_v58  ;;  %v4032_v31 = vld [vmem:[%s4276_s7 + $0x2] ss:$0 sm:$0xff] }
 0x866   :  { %v1971_v57 = vrot.slane %v1955_v22, %v3296_v58  ;;  %v1963_v49 = vcombine.high %v1955_v22, %v1955_v22  ;;  %v1962_v39 = vrot.slane %v1948_v60, %v3296_v58 }
 0x867   :  { %v2081_v59 = vrot.slane %v2020_v4, %v3258_v25  ;;  %v2034_v0 = vrot.slane %v2012_v3, %v3296_v58  ;;  %v2042_v52 = vcombine.high %v2020_v4, %v2020_v4  ;;  %v2027_v63 = vrot.slane %v2011_v40, %v3296_v58  ;;  %v2820_v3 = vld [vmem:[%s4275_s8 + $0x80] sm:$0xff] }
 0x868   :  { %v2049_v9 = vrot.slane %v1971_v57, %v3258_v25  ;;  %v1985_v24 = vrot.slane %v1963_v49, %v3296_v58  ;;  %v1978_v29 = vrot.slane %v1962_v39, %v3296_v58  ;;  %v1964_v15 = vcombine.high %v1962_v39, %v1962_v39  ;;  %v2822_v49 = vld [vmem:[%s4275_s8 + $0x90] sm:$0xff] }
 0x869   :  { %2126 = vrot.lane.b32.xlu1 %v2081_v59, %s3136_s5  ;;  %v2085_v41 = vrot.slane %v2034_v0, %v3258_v25  ;;  %v2089_v28 = vrot.slane %v2042_v52, %v3258_v25  ;;  %v2097_v13 = vrot.slane %v2027_v63, %v3258_v25  ;;  %v1993_v51 = vcombine.high %v1971_v57, %v1971_v57  ;;  %v2821_v57 = vld [vmem:[%s4275_s8 + $0x88] sm:$0xff] }
 0x86a   :  { %2110 = vrot.lane.b32.xlu0 %v2049_v9, %s3136_s5  ;;  %v2053_v46 = vrot.slane %v1985_v24, %v3258_v25  ;;  %v2065_v21 = vrot.slane %v1978_v29, %v3258_v25  ;;  %v1995_v12 = vcombine.high %v1985_v24, %v1985_v24  ;;  %v1992_v14 = vrot.slane %v1964_v15, %v3296_v58  ;;  %v2824_v9 = vld [vmem:[%s4275_s8 + $0xa0] sm:$0xff]  ;;  %v2825_v24 = vld [vmem:[%s4275_s8 + $0xa8] sm:$0xff] }
 0x86b   :  { %v1994_v27 = vcombine.high %v1978_v29, %v1978_v29  ;;  %v2013_v33 = vcombine.high %v2011_v40, %v2011_v40  ;;  %v2057_v5 = vrot.slane %v1993_v51, %v3258_v25  ;;  %v2044_v26 = vcombine.high %v2034_v0, %v2034_v0 }
 0x86c   :  { %v2061_v53 = vrot.slane %v1995_v12, %v3258_v25  ;;  %v2069_v20 = vrot.slane %v1992_v14, %v3258_v25  ;;  %v1996_v38 = vcombine.high %v1992_v14, %v1992_v14  ;;  %v2043_v60 = vcombine.high %v2027_v63, %v2027_v63 }
 0x86d   :  { %2112 = vrot.lane.b32.xlu1 %v2053_v46, %s3136_s5  ;;  %v2073_v43 = vrot.slane %v1994_v27, %v3258_v25  ;;  %v2041_v32 = vrot.slane %v2013_v33, %v3296_v58  ;;  %v2093_v8 = vrot.slane %v2044_v26, %v3258_v25  ;;  %v3099_v59 = vpack.c.bf16 %v2821_v57, %v2820_v3 }
 0x86e   :  { %2128 = vrot.lane.b32.xlu0 %v2085_v41, %s3136_s5  ;;  %v2077_v11 = vrot.slane %v1996_v38, %v3258_v25  ;;  %v2105_v58 = vrot.slane %v2043_v60, %v3258_v25  ;;  %v3107_v0 = vpack.c.bf16 %v2825_v24, %v2824_v9 }
 0x86f   :  { %v2045_v30 = vcombine.high %v2041_v32, %v2041_v32  ;;  %v2101_v22 = vrot.slane %v2041_v32, %v3258_v25  ;;  %3100 = vmatprep.subr.bf16.mxu1 %v3099_v59 }
 0x870   :  { %3102 = vmatpush3.bf16.msra.mxu1 %v3099_v59 }
 0x871   :  { %2118 = vrot.lane.b32.xlu1 %v2065_v21, %s3136_s5  ;;  %v2109_v4 = vrot.slane %v2045_v30, %v3258_v25  ;;  %v2823_v25 = vld [vmem:[%s4275_s8 + $0x98] sm:$0xff] }
 0x872   :  { %2130 = vrot.lane.b32.xlu0 %v2089_v28, %s3136_s5  ;;  %v3103_v39 = vpack.c.bf16 %v2823_v25, %v2822_v49 }
 0x874   :  { %3104 = vmatprep.subr.bf16.mxu1 %v3103_v39 }
 0x875   :  { %2116 = vrot.lane.b32.xlu1 %v2061_v53, %s3136_s5  ;;  %3106 = vmatpush3.bf16.msra.mxu1 %v3103_v39 }
 0x876   :  { %2134 = vrot.lane.b32.xlu0 %v2097_v13, %s3136_s5  ;;  %3108 = vmatprep.subr.bf16.mxu1 %v3107_v0 }
 0x879   :  { %2120 = vrot.lane.b32.xlu1 %v2069_v20, %s3136_s5  ;;  %3110 = vmatpush3.bf16.msra.mxu1 %v3107_v0 }
 0x87a   :  { %2114 = vrot.lane.b32.xlu0 %v2057_v5, %s3136_s5 }
 0x87d   :  { %2122 = vrot.lane.b32.xlu1 %v2073_v43, %s3136_s5 }
 0x87e   :  { %2132 = vrot.lane.b32.xlu0 %v2093_v8, %s3136_s5 }
 0x881   :  { %2124 = vrot.lane.b32.xlu1 %v2077_v11, %s3136_s5 }
 0x882   :  { %2136 = vrot.lane.b32.xlu0 %v2101_v22, %s3136_s5 }
 0x885   :  { %2140 = vrot.lane.b32.xlu1 %v2109_v4, %s3136_s5 }
 0x886   :  { %2138 = vrot.lane.b32.xlu0 %v2105_v58, %s3136_s5 }
 0x8db   :  { %v2127_v46 = vpop.permute.xlu1 %2126 }
 0x8dc   :  { %v2174_v29 = vadd.f32 %v2127_v46, %v3959_v34  ;;  %v2175_v41 = vadd.f32 %v3957_v37, %v2127_v46  ;;  %v2111_v52 = vpop.permute.xlu0 %2110 }
 0x8dd   :  { %v2158_v40 = vadd.f32 %v2111_v52, %v3959_v34  ;;  %v2159_v21 = vadd.f32 %v3957_v37, %v2111_v52 }
 0x8de   :  { %v2212_v12 = vadd.f32 %v4032_v31, %v2174_v29  ;;  %v2213_v15 = vadd.f32 %v4032_v31, %v2175_v41 }
 0x8df   :  { %v2196_v28 = vadd.f32 %v4032_v31, %v2158_v40  ;;  %v2197_v63 = vadd.f32 %v4032_v31, %v2159_v21  ;;  %v2113_v53 = vpop.permute.xlu1 %2112 }
 0x8e0   :  { %v2244_v14 = vmax.f32 %v2212_v12, 0.0  ;;  %v2245_v13 = vmax.f32 %v2213_v15, 0.0  ;;  %v2160_v51 = vadd.f32 %v2113_v53, %v3959_v34  ;;  %v2161_v20 = vadd.f32 %v3957_v37, %v2113_v53  ;;  %v2129_v27 = vpop.permute.xlu0 %2128 }
 0x8e1   :  { %v2228_v33 = vmax.f32 %v2196_v28, 0.0  ;;  %v2229_v5 = vmax.f32 %v2197_v63, 0.0  ;;  %v2176_v26 = vadd.f32 %v2129_v27, %v3959_v34  ;;  %v2177_v43 = vadd.f32 %v3957_v37, %v2129_v27 }
 0x8e2   :  { %v2276_v38 = vmul.f32 %v2244_v14, %v3372_v54  ;;  %v2277_v32 = vmul.f32 %v2245_v13, %v3370_v50  ;;  %v2198_v8 = vadd.f32 %v4032_v31, %v2160_v51  ;;  %v2199_v11 = vadd.f32 %v4032_v31, %v2161_v20 }
 0x8e3   :  { %v2260_v30 = vmul.f32 %v2228_v33, %v3355_v44  ;;  %v2261_v22 = vmul.f32 %v2229_v5, %v3357_v45  ;;  %v2214_v60 = vadd.f32 %v4032_v31, %v2176_v26  ;;  %v2215_v4 = vadd.f32 %v4032_v31, %v2177_v43  ;;  %v2119_v49 = vpop.permute.xlu1 %2118 }
 0x8e4   :  { %v2364_v58 = vsel %vm158_vm2, %v2276_v38, 0.0  ;;  %v2365_v3 = vsel %vm158_vm2, %v2277_v32, 0.0  ;;  %v2230_v57 = vmax.f32 %v2198_v8, 0.0  ;;  %v2231_v54 = vmax.f32 %v2199_v11, 0.0  ;;  %v2131_v52 = vpop.permute.xlu0 %2130 }
 0x8e5   :  { %v2366_v50 = vadd.f32 %v2365_v3, %v2364_v58  ;;  %v2292_v59 = vsel %vm158_vm2, %v2260_v30, 0.0  ;;  %v2293_v25 = vsel %vm158_vm2, %v2261_v22, 0.0  ;;  %v2246_v39 = vmax.f32 %v2214_v60, 0.0 }
 0x8e6   :  { %v2294_v44 = vadd.f32 %v2293_v25, %v2292_v59  ;;  %v2262_v45 = vmul.f32 %v2230_v57, %v3362_v47  ;;  %v2263_v9 = vmul.f32 %v2231_v54, %v3364_v48  ;;  %v2247_v24 = vmax.f32 %v2215_v4, 0.0 }
 0x8e7   :  { %v2367_v0 = vrot.slane %v2366_v50, 4  ;;  %v2278_v46 = vmul.f32 %v2246_v39, %v3376_v23  ;;  %v2166_v29 = vadd.f32 %v2119_v49, %v3959_v34  ;;  %v2167_v41 = vadd.f32 %v3957_v37, %v2119_v49  ;;  %v2117_v58 = vpop.permute.xlu1 %2116 }
 0x8e8   :  { %v2295_v40 = vrot.slane %v2294_v44, 4  ;;  %v2301_v21 = vsel %vm158_vm2, %v2262_v45, 0.0  ;;  %v2302_v12 = vsel %vm158_vm2, %v2263_v9, 0.0  ;;  %v2279_v15 = vmul.f32 %v2247_v24, %v3374_v55  ;;  %v2135_v9 = vpop.permute.xlu0 %2134 }
 0x8e9   :  { %v2368_v28 = vadd.f32 %v2367_v0, %v2366_v50  ;;  %v2303_v47 = vadd.f32 %v2302_v12, %v2301_v21  ;;  %v2373_v48 = vsel %vm158_vm2, %v2278_v46, 0.0  ;;  %v2204_v63 = vadd.f32 %v4032_v31, %v2166_v29 }
 0x8ea   :  { %v2296_v53 = vadd.f32 %v2295_v40, %v2294_v44  ;;  %v2374_v23 = vsel %vm158_vm2, %v2279_v15, 0.0  ;;  %v2205_v14 = vadd.f32 %v4032_v31, %v2167_v41  ;;  %v2178_v13 = vadd.f32 %v2131_v52, %v3959_v34 }
 0x8eb   :  { %v2369_v51 = vrot.slane %v2368_v28, 2  ;;  %v2304_v20 = vrot.slane %v2303_v47, 4  ;;  %v2375_v27 = vadd.f32 %v2374_v23, %v2373_v48  ;;  %v2236_v33 = vmax.f32 %v2204_v63, 0.0 }
 0x8ec   :  { %v2297_v5 = vrot.slane %v2296_v53, 2  ;;  %v2237_v26 = vmax.f32 %v2205_v14, 0.0  ;;  %v2179_v55 = vadd.f32 %v3957_v37, %v2131_v52  ;;  %v2216_v43 = vadd.f32 %v4032_v31, %v2178_v13 }
 0x8ed   :  { %v2370_v38 = vadd.f32 %v2369_v51, %v2368_v28  ;;  %v2305_v32 = vadd.f32 %v2304_v20, %v2303_v47  ;;  %v2376_v8 = vrot.slane %v2375_v27, 4  ;;  %v2268_v11 = vmul.f32 %v2236_v33, %v3406_v7  ;;  %v2121_v47 = vpop.permute.xlu1 %2120 }
 0x8ee   :  { %v2298_v30 = vadd.f32 %v2297_v5, %v2296_v53  ;;  %v2269_v22 = vmul.f32 %v2237_v26, %v3404_v6  ;;  %v2217_v60 = vadd.f32 %v4032_v31, %v2179_v55  ;;  %v2248_v4 = vmax.f32 %v2216_v43, 0.0  ;;  %v4324_v55 = vld [vmem:[#allocation5_spill] sm:$0xff] }
 0x8ef   :  { %v2371_v3 = vrot.slane %v2370_v38, 1  ;;  %v2306_v57 = vrot.slane %v2305_v32, 2  ;;  %v2377_v54 = vadd.f32 %v2376_v8, %v2375_v27  ;;  %v2328_v49 = vsel %vm158_vm2, %v2268_v11, 0.0  ;;  %v2115_v8 = vpop.permute.xlu0 %2114 }
 0x8f0   :  { %v2299_v50 = vrot.slane %v2298_v30, 1  ;;  %v2329_v59 = vsel %vm158_vm2, %v2269_v22, 0.0  ;;  %v2249_v25 = vmax.f32 %v2217_v60, 0.0  ;;  %v2280_v39 = vmul.f32 %v2248_v4, %v3396_v1  ;;  %v4325_v4 = vld [vmem:[#allocation4_spill] sm:$0xff] }
 0x8f1   :  { %v4079_v44 = vadd.f32 %v2371_v3, %v2370_v38  ;;  %v2307_v7 = vadd.f32 %v2306_v57, %v2305_v32  ;;  %v2378_v45 = vrot.slane %v2377_v54, 2  ;;  %v2330_v6 = vadd.f32 %v2329_v59, %v2328_v49  ;;  %v4326_v57 = vld [vmem:[#allocation11_spill] sm:$0xff]  ;;  %v4327_v49 = vld [vmem:[#allocation10_spill] sm:$0xff] }
 0x8f2   :  { %v4081_v24 = vadd.f32 %v2299_v50, %v2298_v30  ;;  %v2281_v0 = vmul.f32 %v2249_v25, %v3391_v62  ;;  %v2382_v46 = vsel %vm158_vm2, %v2280_v39, 0.0  ;;  %v2164_v29 = vadd.f32 %v2117_v58, %v3959_v34 }
 0x8f3   :  { %v2308_v41 = vrot.slane %v2307_v7, 1  ;;  %v2379_v52 = vadd.f32 %v2378_v45, %v2377_v54  ;;  %v2331_v40 = vrot.slane %v2330_v6, 4  ;;  %v2165_v21 = vadd.f32 %v3957_v37, %v2117_v58  ;;  %v2123_v45 = vpop.permute.xlu1 %2122 }
 0x8f4   :  { %v2383_v1 = vsel %vm158_vm2, %v2281_v0, 0.0  ;;  %v2202_v12 = vadd.f32 %v4032_v31, %v2164_v29  ;;  %v2182_v15 = vadd.f32 %v2135_v9, %v3959_v34  ;;  %v2183_v28 = vadd.f32 %v3957_v37, %v2135_v9 }
 0x8f5   :  { %v4091_v48 = vadd.f32 %v2308_v41, %v2307_v7  ;;  %v2380_v62 = vrot.slane %v2379_v52, 1  ;;  %v2332_v63 = vadd.f32 %v2331_v40, %v2330_v6  ;;  %v2384_v53 = vadd.f32 %v2383_v1, %v2382_v46 }
 0x8f6   :  { %v2203_v23 = vadd.f32 %v4032_v31, %v2165_v21  ;;  %v2234_v14 = vmax.f32 %v2202_v12, 0.0  ;;  %v2220_v13 = vadd.f32 %v4032_v31, %v2182_v15  ;;  %v2221_v51 = vadd.f32 %v4032_v31, %v2183_v28  ;;  %v4328_v21 = vld [vmem:[#allocation9_spill] sm:$0xff] }
 0x8f7   :  { %v4096_v20 = vadd.f32 %v2380_v62, %v2379_v52  ;;  %v2333_v27 = vrot.slane %v2332_v63, 2  ;;  %v2385_v33 = vrot.slane %v2384_v53, 4  ;;  %v2168_v5 = vadd.f32 %v2121_v47, %v3959_v34 }
 0x8f8   :  { %v2235_v26 = vmax.f32 %v2203_v23, 0.0  ;;  %v2266_v43 = vmul.f32 %v2234_v14, %v4324_v55  ;;  %v2252_v38 = vmax.f32 %v2220_v13, 0.0  ;;  %v2253_v32 = vmax.f32 %v2221_v51, 0.0 }
 0x8f9   :  { %v4100_v11 = vadd.f32 %v2333_v27, %v2332_v63  ;;  %v2386_v30 = vadd.f32 %v2385_v33, %v2384_v53  ;;  %v2169_v22 = vadd.f32 %v3957_v37, %v2121_v47  ;;  %v2206_v60 = vadd.f32 %v4032_v31, %v2168_v5  ;;  %v4329_v53 = vld [vmem:[#allocation8_spill] sm:$0xff]  ;;  %v2133_v33 = vpop.permute.xlu0 %2132 }
 0x8fa   :  { %v2267_v58 = vmul.f32 %v2235_v26, %v4325_v4  ;;  %v2319_v3 = vsel %vm158_vm2, %v2266_v43, 0.0  ;;  %v2284_v54 = vmul.f32 %v2252_v38, %v4326_v57  ;;  %v2285_v50 = vmul.f32 %v2253_v32, %v4327_v49  ;;  %v4330_v32 = vld [vmem:[#allocation3_spill] sm:$0xff] }
 0x8fb   :  { %v2387_v59 = vrot.slane %v2386_v30, 2  ;;  %v2207_v25 = vadd.f32 %v4032_v31, %v2169_v22  ;;  %v2238_v39 = vmax.f32 %v2206_v60, 0.0  ;;  %v2162_v7 = vadd.f32 %v2115_v8, %v3959_v34 }
 0x8fc   :  { %v2320_v6 = vsel %vm158_vm2, %v2267_v58, 0.0  ;;  %v2400_v9 = vsel %vm158_vm2, %v2284_v54, 0.0  ;;  %v2401_v0 = vsel %vm158_vm2, %v2285_v50, 0.0  ;;  %v2163_v46 = vadd.f32 %v3957_v37, %v2115_v8 }
 0x8fd   :  { %v2388_v29 = vadd.f32 %v2387_v59, %v2386_v30  ;;  %v2321_v41 = vadd.f32 %v2320_v6, %v2319_v3  ;;  %v2402_v52 = vadd.f32 %v2401_v0, %v2400_v9  ;;  %v2239_v40 = vmax.f32 %v2207_v25, 0.0  ;;  %v4331_v30 = vld [vmem:[#allocation2_spill] sm:$0xff]  ;;  %v2125_v25 = vpop.permute.xlu1 %2124  ;;  %v4332_v0 = vld [vmem:[#allocation13_spill] sm:$0xff] }
 0x8fe   :  { %v2270_v1 = vmul.f32 %v2238_v39, %v4328_v21  ;;  %v2200_v12 = vadd.f32 %v4032_v31, %v2162_v7  ;;  %v2201_v15 = vadd.f32 %v4032_v31, %v2163_v46  ;;  %v2170_v28 = vadd.f32 %v2123_v45, %v3959_v34  ;;  %v4333_v21 = vld [vmem:[#allocation12_spill] sm:$0xff] }
 0x8ff   :  { %v2389_v47 = vrot.slane %v2388_v29, 1  ;;  %v2322_v62 = vrot.slane %v2321_v41, 4  ;;  %v2403_v63 = vrot.slane %v2402_v52, 4  ;;  %v2271_v23 = vmul.f32 %v2239_v40, %v4329_v53 }
 0x900   :  { %v2337_v14 = vsel %vm158_vm2, %v2270_v1, 0.0  ;;  %v2232_v13 = vmax.f32 %v2200_v12, 0.0  ;;  %v2233_v51 = vmax.f32 %v2201_v15, 0.0  ;;  %v2171_v27 = vadd.f32 %v3957_v37, %v2123_v45  ;;  %v2137_v15 = vpop.permute.xlu0 %2136 }
 0x901   :  { %v4121_v5 = vadd.f32 %v2389_v47, %v2388_v29  ;;  %v2323_v26 = vadd.f32 %v2322_v62, %v2321_v41  ;;  %v2404_v55 = vadd.f32 %v2403_v63, %v2402_v52  ;;  %v2338_v43 = vsel %vm158_vm2, %v2271_v23, 0.0 }
 0x902   :  { %v2339_v38 = vadd.f32 %v2338_v43, %v2337_v14  ;;  %v2264_v8 = vmul.f32 %v2232_v13, %v4330_v32  ;;  %v2265_v22 = vmul.f32 %v2233_v51, %v4331_v30  ;;  %v2208_v60 = vadd.f32 %v4032_v31, %v2170_v28  ;;  %v2141_v30 = vpop.permute.xlu1 %2140 }
 0x903   :  { %v2324_v4 = vrot.slane %v2323_v26, 2  ;;  %v2405_v58 = vrot.slane %v2404_v55, 2  ;;  %v2209_v3 = vadd.f32 %v4032_v31, %v2171_v27  ;;  %v2180_v57 = vadd.f32 %v2133_v33, %v3959_v34 }
 0x904   :  { %v2340_v54 = vrot.slane %v2339_v38, 4  ;;  %v2310_v49 = vsel %vm158_vm2, %v2264_v8, 0.0  ;;  %v2311_v50 = vsel %vm158_vm2, %v2265_v22, 0.0  ;;  %v2240_v59 = vmax.f32 %v2208_v60, 0.0 }
 0x905   :  { %v4131_v39 = vadd.f32 %v2324_v4, %v2323_v26  ;;  %v4133_v7 = vadd.f32 %v2405_v58, %v2404_v55  ;;  %v2312_v45 = vadd.f32 %v2311_v50, %v2310_v49  ;;  %v2241_v6 = vmax.f32 %v2209_v3, 0.0 }
 0x906   :  { %v4135_v9 = vadd.f32 %v2340_v54, %v2339_v38  ;;  %v2272_v46 = vmul.f32 %v2240_v59, %v4332_v0  ;;  %v2181_v29 = vadd.f32 %v3957_v37, %v2133_v33  ;;  %v2218_v41 = vadd.f32 %v4032_v31, %v2180_v57  ;;  %v4334_v33 = vld [vmem:[#allocation7_spill] sm:$0xff] }
 0x907   :  { %v2326_v52 = vrot.slane %v4131_v39, 1  ;;  %v2313_v40 = vrot.slane %v2312_v45, 4  ;;  %v2273_v1 = vmul.f32 %v2241_v6, %v4333_v21  ;;  %v2172_v12 = vadd.f32 %v2125_v25, %v3959_v34  ;;  %v2139_v6 = vpop.permute.xlu0 %2138 }
 0x908   :  { %v2342_v28 = vrot.slane %v4135_v9, 2  ;;  %v2346_v47 = vsel %vm158_vm2, %v2272_v46, 0.0  ;;  %v2219_v62 = vadd.f32 %v4032_v31, %v2181_v29  ;;  %v2250_v63 = vmax.f32 %v2218_v41, 0.0 }
 0x909   :  { %v2314_v53 = vadd.f32 %v2313_v40, %v2312_v45  ;;  %v2347_v23 = vsel %vm158_vm2, %v2273_v1, 0.0  ;;  %v2173_v14 = vadd.f32 %v3957_v37, %v2125_v25  ;;  %v2210_v13 = vadd.f32 %v4032_v31, %v2172_v12 }
 0x90a   :  { %v2348_v51 = vadd.f32 %v2347_v23, %v2346_v47  ;;  %v2251_v27 = vmax.f32 %v2219_v62, 0.0  ;;  %v2282_v26 = vmul.f32 %v2250_v63, %v4334_v33  ;;  %v2184_v55 = vadd.f32 %v2137_v15, %v3959_v34 }
 0x90b   :  { %v2315_v43 = vrot.slane %v2314_v53, 2  ;;  %v2211_v38 = vadd.f32 %v4032_v31, %v2173_v14  ;;  %v2242_v32 = vmax.f32 %v2210_v13, 0.0  ;;  %v2185_v8 = vadd.f32 %v3957_v37, %v2137_v15 }
 0x90c   :  { %v2349_v22 = vrot.slane %v2348_v51, 4  ;;  %v2283_v60 = vmul.f32 %v2251_v27, %v4323_v61  ;;  %v2391_v4 = vsel %vm158_vm2, %v2282_v26, 0.0  ;;  %v2222_v58 = vadd.f32 %v4032_v31, %v2184_v55 }
 0x90d   :  { %v2316_v3 = vadd.f32 %v2315_v43, %v2314_v53  ;;  %v2243_v57 = vmax.f32 %v2211_v38, 0.0  ;;  %v2274_v54 = vmul.f32 %v2242_v32, %v3430_v19  ;;  %v2223_v49 = vadd.f32 %v4032_v31, %v2185_v8 }
 0x90e   :  { %v2350_v50 = vadd.f32 %v2349_v22, %v2348_v51  ;;  %v2392_v59 = vsel %vm158_vm2, %v2283_v60, 0.0  ;;  %v2254_v25 = vmax.f32 %v2222_v58, 0.0  ;;  %v2188_v45 = vadd.f32 %v2141_v30, %v3959_v34 }
 0x90f   :  { %v2317_v0 = vrot.slane %v2316_v3, 1  ;;  %v2393_v46 = vadd.f32 %v2392_v59, %v2391_v4  ;;  %v2275_v61 = vmul.f32 %v2243_v57, %v3428_v18  ;;  %v2355_v29 = vsel %vm158_vm2, %v2274_v54, 0.0 }
 0x910   :  { %v2255_v41 = vmax.f32 %v2223_v49, 0.0  ;;  %v2286_v40 = vmul.f32 %v2254_v25, %v3426_v17  ;;  %v2189_v19 = vadd.f32 %v3957_v37, %v2141_v30  ;;  %v2226_v21 = vadd.f32 %v4032_v31, %v2188_v45 }
 0x911   :  { %v2318_v1 = vadd.f32 %v2317_v0, %v2316_v3  ;;  %v2394_v12 = vrot.slane %v2393_v46, 4  ;;  %v2356_v15 = vsel %vm158_vm2, %v2275_v61, 0.0  ;;  %v2186_v47 = vadd.f32 %v2139_v6, %v3959_v34 }
 0x912   :  { %v2357_v62 = vadd.f32 %v2356_v15, %v2355_v29  ;;  %v2287_v63 = vmul.f32 %v2255_v41, %v3424_v16  ;;  %v2409_v18 = vsel %vm158_vm2, %v2286_v40, 0.0  ;;  %v2227_v53 = vadd.f32 %v4032_v31, %v2189_v19 }
 0x913   :  { %v2395_v23 = vadd.f32 %v2394_v12, %v2393_v46  ;;  %v2258_v14 = vmax.f32 %v2226_v21, 0.0  ;;  %v2187_v17 = vadd.f32 %v3957_v37, %v2139_v6  ;;  %v2224_v13 = vadd.f32 %v4032_v31, %v2186_v47 }
 0x914   :  { %v2358_v51 = vrot.slane %v2357_v62, 4  ;;  %v2410_v27 = vsel %vm158_vm2, %v2287_v63, 0.0  ;;  %v2259_v33 = vmax.f32 %v2227_v53, 0.0  ;;  %v2327_v26 = vadd.f32 %v2326_v52, %v4131_v39 }
 0x915   :  { %v2396_v34 = vrot.slane %v2395_v23, 2  ;;  %v2411_v55 = vadd.f32 %v2410_v27, %v2409_v18  ;;  %v2290_v16 = vmul.f32 %v2258_v14, %v3581_v36  ;;  %v2225_v43 = vadd.f32 %v4032_v31, %v2187_v17 }
 0x916   :  { %v2291_v38 = vmul.f32 %v2259_v33, %v3575_v35  ;;  %v2256_v32 = vmax.f32 %v2224_v13, 0.0  ;;  %v2335_v8 = vrot.slane %v4100_v11, 1  ;;  %v2343_v37 = vadd.f32 %v2342_v28, %v4135_v9 }
 0x917   :  { %v2397_v30 = vadd.f32 %v2396_v34, %v2395_v23  ;;  %v2412_v22 = vrot.slane %v2411_v55, 4  ;;  %v2427_v60 = vsel %vm158_vm2, %v2290_v16, 0.0  ;;  %v2257_v4 = vmax.f32 %v2225_v43, 0.0 }
 0x918   :  { %v2428_v39 = vsel %vm158_vm2, %v2291_v38, 0.0  ;;  %v2288_v52 = vmul.f32 %v2256_v32, %v3562_v10  ;;  %v2336_v36 = vadd.f32 %v2335_v8, %v4100_v11  ;;  %v2344_v58 = vrot.slane %v2343_v37, 1 }
 0x919   :  { %v2398_v31 = vrot.slane %v2397_v30, 1  ;;  %v2413_v3 = vadd.f32 %v2412_v22, %v2411_v55  ;;  %v2429_v35 = vadd.f32 %v2428_v39, %v2427_v60  ;;  %v2289_v57 = vmul.f32 %v2257_v4, %v3555_v56  ;;  %v2576_v4 = vld [vmem:[%s4278_s10] sm:$0xff]  ;;  %v2577_v39 = vld [vmem:[%s4278_s10 + $0x8] sm:$0xff] }
 0x91a   :  { %v2418_v54 = vsel %vm158_vm2, %v2288_v52, 0.0  ;;  %v2345_v9 = vadd.f32 %v2344_v58, %v2343_v37  ;;  %v2351_v28 = vrot.slane %v2350_v50, 2  ;;  %v2359_v49 = vadd.f32 %v2358_v51, %v2357_v62  ;;  %v2578_v52 = vld [vmem:[%s4278_s10 + $0x10] sm:$0xff]  ;;  %v2579_v58 = vld [vmem:[%s4278_s10 + $0x18] sm:$0xff]  ;;  %s3138_s10 = smov 64  }
 0x91b   :  { %v2414_v59 = vrot.slane %v2413_v3, 2  ;;  %v2430_v25 = vrot.slane %v2429_v35, 4  ;;  %v2419_v45 = vsel %vm158_vm2, %v2289_v57, 0.0  ;;  %v2463_v10 = vsel %vm1019_vm3, %v4091_v48, %v4081_v24  ;;  %v2826_v24 = vld [vmem:[%s4275_s8 + $0xb0] sm:$0xff]  ;;  %v2827_v48 = vld [vmem:[%s4275_s8 + $0xb8] sm:$0xff] }
 0x91c   :  { %v2420_v11 = vadd.f32 %v2419_v45, %v2418_v54  ;;  %v2352_v6 = vadd.f32 %v2351_v28, %v2350_v50  ;;  %v2360_v0 = vrot.slane %v2359_v49, 2  ;;  %v2464_v46 = vsel %vm1021_vm5, %v2318_v1, %v2463_v10  ;;  %v2829_v54 = vld [vmem:[%s4277_s9 + $0x2] ss:$0 sm:$0xff] }
 0x91d   :  { %v2465_v56 = vsel %vm1023_vm4, %v2327_v26, %v2464_v46  ;;  %v2399_v61 = vadd.f32 %v2398_v31, %v2397_v30  ;;  %v2407_v29 = vrot.slane %v4133_v7, 1  ;;  %v2415_v41 = vadd.f32 %v2414_v59, %v2413_v3  ;;  %v2670_v3 = vld [vmem:[%s4279_s12] sm:$0xff] }
 0x91e   :  { %v2421_v40 = vrot.slane %v2420_v11, 4  ;;  %v2353_v19 = vrot.slane %v2352_v6, 1  ;;  %v2361_v21 = vadd.f32 %v2360_v0, %v2359_v49  ;;  %v2466_v12 = vsel %vm1025_vm6, %v2336_v36, %v2465_v56  ;;  %v2673_v0 = vld [vmem:[%s4279_s12 + $0x18] sm:$0xff] }
 0x91f   :  { %v2467_v50 = vsel %vm1027_vm7, %v2345_v9, %v2466_v12  ;;  %v2408_v1 = vadd.f32 %v2407_v29, %v4133_v7  ;;  %v2416_v15 = vrot.slane %v2415_v41, 1  ;;  %v2431_v47 = vadd.f32 %v2430_v25, %v2429_v35  ;;  %v2671_v35 = vld [vmem:[%s4279_s12 + $0x8] sm:$0xff] }
 0x920   :  { %v2422_v62 = vadd.f32 %v2421_v40, %v2420_v11  ;;  %v2354_v63 = vadd.f32 %v2353_v19, %v2352_v6  ;;  %v2362_v18 = vrot.slane %v2361_v21, 1  ;;  %v2470_v53 = vsel %vm1019_vm3, %v4096_v20, %v4079_v44  ;;  %v2672_v6 = vld [vmem:[%s4279_s12 + $0x10] sm:$0xff]  ;;  %v2835_v19 = vld [vmem:[%s4281_s13] ss:$0 sm:$0xff] }
 0x921   :  { %v2417_v23 = vadd.f32 %v2416_v15, %v2415_v41  ;;  %v2432_v14 = vrot.slane %v2431_v47, 2  ;;  %v2471_v17 = vsel %vm1021_vm5, %v4121_v5, %v2470_v53  ;;  %v3111_v13 = vpack.c.bf16 %v2827_v48, %v2826_v24 }
 0x922   :  { %v2363_v51 = vadd.f32 %v2362_v18, %v2361_v21  ;;  %v2468_v27 = vsel %vm1029_vm8, %v2354_v63, %v2467_v50  ;;  %v2423_v33 = vrot.slane %v2422_v62, 2  ;;  %v2472_v7 = vsel %vm1023_vm4, %v2399_v61, %v2471_v17 }
 0x923   :  { %v2433_v26 = vadd.f32 %v2432_v14, %v2431_v47  ;;  %v2473_v34 = vsel %vm1025_vm6, %v2408_v1, %v2472_v7  ;;  %3112 = vmatprep.subr.bf16.mxu1 %v3111_v13  ;;  %v3115_v36 = vpack.c.bf16 %v2577_v39, %v2576_v4  ;;  %v3119_v31 = vpack.c.bf16 %v2579_v58, %v2578_v52 }
 0x924   :  { %v2469_v55 = vsel %vm1031_vm9, %v2363_v51, %v2468_v27  ;;  %v2424_v16 = vadd.f32 %v2423_v33, %v2422_v62  ;;  %v2474_v44 = vsel %vm1027_vm7, %v2417_v23, %v2473_v34  ;;  %3114 = vmatpush3.bf16.msra.mxu1 %v3111_v13  ;;  %v3123_v57 = vpack.c.bf16 %v2671_v35, %v2670_v3 }
 0x925   :  { %2477 = vrot.lane.b32.xlu0 %v2469_v55, %s3137_s20  ;;  %v2434_v20 = vrot.slane %v2433_v26, 1  ;;  %3116 = vmatprep.subr.bf16.mxu0 %v3115_v36  ;;  %v3127_v46 = vpack.c.bf16 %v2673_v0, %v2672_v6 }
 0x926   :  { %v2425_v5 = vrot.slane %v2424_v16, 1  ;;  %3118 = vmatpush3.bf16.msra.mxu0 %v3115_v36 }
 0x927   :  { %v2435_v38 = vadd.f32 %v2434_v20, %v2433_v26  ;;  %3120 = vmatprep.subr.bf16.mxu0 %v3119_v31 }
 0x928   :  { %v2426_v43 = vadd.f32 %v2425_v5, %v2424_v16 }
 0x92a   :  { %v2475_v32 = vsel %vm1029_vm8, %v2426_v43, %v2474_v44  ;;  %3122 = vmatpush3.bf16.msra.mxu0 %v3119_v31 }
 0x92b   :  { %v2476_v8 = vsel %vm1031_vm9, %v2435_v38, %v2475_v32  ;;  %3124 = vmatprep.subr.bf16.mxu0 %v3123_v57 }
 0x92c   :  { %2479 = vrot.lane.b32.xlu1 %v2476_v8, %s3137_s20 }
 0x997   :  { %v2478_v37 = vpop.permute.xlu0 %2477 }
 0x998   :  { %v2483_v30 = vsel %vm158_vm2, %v3948_v2, %v2478_v37 }
 0x999   :  { %3010 = vmatprep.mubr.msk.f32.mxu1 %vm1054_vm10, %v2483_v30 }
 0x99e   :  { %v2480_v22 = vpop.permute.xlu1 %2479 }
 0x99f   :  { %v2484_v60 = vsel %vm158_vm2, %v3951_v42, %v2480_v22 }
 0x9a0   :  { %3011 = vmatmul.mubr.msk.f32.vlgmr.msra.gmra.mrb[6].mxu1 %vm1054_vm10, %v2484_v60 }
 0xa73   :  { %v3012_v9 = vpop.f32.mrb[6].mxu1 }
 0xa74   :  { %v2569_v28 = vadd.f32 %v3012_v9, %v2829_v54  ;;  %v2563_v49 = vpop.f32.mrb[7].mxu1 }
 0xa75   :  { %v2564_v59 = vadd.f32 %v2829_v54, %v2563_v49 }
 0xa76   :  { %v2573_v25 = vmax.f32 %v2569_v28, 0.0 }
 0xa77   :  { %v2572_v45 = vmax.f32 %v2564_v59, 0.0 }
 0xa78   :  { %v2575_v10 = vadd.f32 %v2573_v25, %v3951_v42 }
 0xa79   :  { %v2574_v11 = vadd.f32 %v2572_v45, %v3948_v2  ;;  %v2832_v2 = vld [vmem:[%s4280_s11] ss:$0 sm:$0xff] }
 0xa7a   :  { %2764 = vrot.lane.b32.xlu1 %v2575_v10, %s3138_s10 }
 0xa7b   :  { %2762 = vrot.lane.b32.xlu0 %v2574_v11, %s3138_s10  ;;  %3021 = vmatprep.mubr.msk.f32.mxu0 %vm158_vm2, %v2574_v11 }
 0xa7c   :  { %3022 = vmatmul.mubr.msk.f32.vlgmr.msra.gmra.mrb[8].mxu0 %vm158_vm2, %v2575_v10 }
 0xa7d   :  { %3126 = vmatpush3.bf16.msra.mxu0 %v3123_v57 }
 0xa7e   :  { %3128 = vmatprep.subr.bf16.mxu0 %v3127_v46 }
 0xa81   :  { %3130 = vmatpush3.bf16.msra.mxu0 %v3127_v46 }
 0xaec   :  { %v2765_v48 = vpop.permute.xlu1 %2764 }
 0xaed   :  { %v2763_v1 = vpop.permute.xlu0 %2762 }
 0xb4f   :  { %v3023_v42 = vpop.f32.mrb[8].mxu0 }
 0xb50   :  { %v2665_v56 = vadd.f32 %v3023_v42, %v2832_v2  ;;  %v2659_v61 = vpop.f32.mrb[9].mxu0 }
 0xb51   :  { %v2660_v29 = vadd.f32 %v2832_v2, %v2659_v61 }
 0xb52   :  { %v2669_v40 = vmax.f32 %v2665_v56, 0.0 }
 0xb53   :  { %v2668_v41 = vmax.f32 %v2660_v29, 0.0 }
 0xb55   :  { %3032 = vmatprep.mubr.msk.f32.mxu0 %vm158_vm2, %v2668_v41 }
 0xb56   :  { %3033 = vmatmul.mubr.msk.f32.vlgmr.msra.gmra.mrb[10].mxu0 %vm158_vm2, %v2669_v40 }
 0xc29   :  { %v3034_v21 = vpop.f32.mrb[10].mxu0 }
 0xc2a   :  { %v2759_v12 = vadd.f32 %v3034_v21, %v2835_v19  ;;  %v2753_v24 = vpop.f32.mrb[11].mxu0 }
 0xc2b   :  { %v2754_v50 = vadd.f32 %v2835_v19, %v2753_v24 }
 0xc2c   :  { %v2769_v15 = vsel %vm1054_vm10, %v2759_v12, %v2765_v48 }
 0xc2d   :  { %v2772_v47 = vsel %vm2770_vm11, %v2769_v15, 0.0  ;;  %v2768_v62 = vsel %vm1054_vm10, %v2754_v50, %v2763_v1 }
 0xc2e   :  { %2774 = vst [vmem:[%s4282_s14 + $0x8] sm:$0xff] %v2772_v47  ;;  %v2771_v63 = vsel %vm2770_vm11, %v2768_v62, 0.0 }
 0xc2f   :  { %2773 = vst [vmem:[%s4282_s14] sm:$0xff] %v2771_v63 }

</bundles_post_ra>
